<compile_context>
chip_gen: v7x
topology: tpu7x:2x2x1
jax: 0.10.0
libtpu: 0.0.40
codegen_flags: <defaults>
</compile_context>

<pallas_src>
from functools import partial

import jax
import jax.numpy as jnp
from jax.experimental import pallas as pl
from jax.experimental.pallas import tpu as pltpu


def rnn_kernel(x_ref, wih_ref, whh_ref, b_ref, o_ref, xp_ref):
    """Single-layer tanh RNN over a tile of Bt sequences (time-major).

    x_ref:   (T, Bt, I)  time-major input tile
    wih_ref: (I, H)      W_ih^T (hidden on lanes)
    whh_ref: (H, H)      W_hh^T
    b_ref:   (1, H)      b_ih + b_hh, pre-combined
    o_ref:   (T, Bt, H)  time-major output hidden states
    xp_ref:  (T, Bt, H)  f32 VMEM scratch: input projection for all timesteps
    """
    T, Bt, I = x_ref.shape
    H = whh_ref.shape[0]

    # (1) Input projection for ALL timesteps and all Bt sequences at once:
    #     one flattened bf16 MXU matmul, f32 accumulation, fused bias add.
    x_flat = x_ref[...].reshape(T * Bt, I).astype(jnp.bfloat16)
    wih = wih_ref[...].astype(jnp.bfloat16)
    xp = jnp.dot(x_flat, wih, preferred_element_type=jnp.float32) + b_ref[...]
    xp_ref[...] = xp.reshape(T, Bt, H)

    # Hoist the recurrent weight (and its bf16 cast) out of the time loop.
    whh = whh_ref[...].astype(jnp.bfloat16)

    # (2) Sequential recurrence. h_0 = 0 (PyTorch default when h is not given).
    #     The (Bt, H) hidden state stays in vregs as the fori_loop carry; each
    #     per-step load/store is a full (8, 128) unmasked tile.
    def step(t, h):
        pre = xp_ref[t] + jnp.dot(h.astype(jnp.bfloat16), whh,
                                  preferred_element_type=jnp.float32)
        h_new = jnp.tanh(pre)
        o_ref[t] = h_new.astype(o_ref.dtype)
        return h_new

    h0 = jnp.zeros((Bt, H), jnp.float32)
    # Full unroll is right for short T; switch to a fixed unroll=8 once T grows.
    jax.lax.fori_loop(0, T, step, h0, unroll=True)


@partial(jax.jit, static_argnames=("batch_tile",))
def simple_rnn_block(x, w_ih, w_hh, b_ih, b_hh, batch_tile=8):
    """Forward of SimpleRNNBlock: out, _ = nn.RNN(batch_first=True)(x).

    x:    (B, T, input_size)
    w_ih: (H, input_size)   weight_ih_l0
    w_hh: (H, H)            weight_hh_l0
    b_ih: (H,)              bias_ih_l0
    b_hh: (H,)              bias_hh_l0
    returns (B, T, H)
    """
    B, T, I = x.shape
    H = w_ih.shape[0]
    Bt = min(batch_tile, B)
    assert B % Bt == 0, (B, Bt)

    # Time-major layout so every per-step (Bt, H) slice is a contiguous tile.
    x_tm = jnp.transpose(x, (1, 0, 2))       # (T, B, I)
    w_ih_t = jnp.transpose(w_ih)             # (I, H): hidden on lanes
    w_hh_t = jnp.transpose(w_hh)             # (H, H)
    bias = (b_ih + b_hh).reshape(1, H).astype(jnp.float32)

    out_tm = pl.pallas_call(
        rnn_kernel,
        out_shape=jax.ShapeDtypeStruct((T, B, H), x.dtype),
        grid=(B // Bt,),
        in_specs=[
            pl.BlockSpec((T, Bt, I), lambda b: (0, b, 0)),
            pl.BlockSpec((I, H), lambda b: (0, 0)),
            pl.BlockSpec((H, H), lambda b: (0, 0)),
            pl.BlockSpec((1, H), lambda b: (0, 0)),
        ],
        out_specs=pl.BlockSpec((T, Bt, H), lambda b: (0, b, 0)),
        scratch_shapes=[pltpu.VMEM((T, Bt, H), jnp.float32)],
        compiler_params=pltpu.CompilerParams(
            dimension_semantics=("parallel",)),   # batch tiles → 2 TCs on v7x
    )(x_tm, w_ih_t, w_hh_t, bias)

    return jnp.transpose(out_tm, (1, 0, 2))       # back to (B, T, H)


def rnn_reference(x, w_ih, w_hh, b_ih, b_hh):
    """Pure-JAX reference matching torch.nn.RNN (tanh, batch_first, 1 layer)."""
    B, _, _ = x.shape
    H = w_ih.shape[0]

    def step(h, x_t):
        pre = (jnp.dot(x_t, w_ih.T, precision="highest") + b_ih
               + jnp.dot(h, w_hh.T, precision="highest") + b_hh)
        h_new = jnp.tanh(pre)
        return h_new, h_new

    h0 = jnp.zeros((B, H), x.dtype)
    _, ys = jax.lax.scan(step, h0, jnp.swapaxes(x, 0, 1))   # time-major scan
    return jnp.swapaxes(ys, 0, 1)                            # back to (B, T, H)


if __name__ == "__main__":
    # Small shapes consistent with SimpleRNNBlock(input_size=16, hidden_size=128).
    # B=16 so batch tiles of Bt=8 fill the sublane / MXU-row dimension and the
    # grid still has 2 parallel steps for v7x's two TensorCores.
    B, T, I, H = 16, 16, 16, 128

    key = jax.random.PRNGKey(0)
    kx, k1, k2, k3, k4 = jax.random.split(key, 5)
    bound = 1.0 / (H ** 0.5)   # PyTorch nn.RNN init range

    x = jax.random.normal(kx, (B, T, I), dtype=jnp.float32)
    w_ih = jax.random.uniform(k1, (H, I), jnp.float32, -bound, bound)
    w_hh = jax.random.uniform(k2, (H, H), jnp.float32, -bound, bound)
    b_ih = jax.random.uniform(k3, (H,), jnp.float32, -bound, bound)
    b_hh = jax.random.uniform(k4, (H,), jnp.float32, -bound, bound)

    out = jax.block_until_ready(simple_rnn_block(x, w_ih, w_hh, b_ih, b_hh))

    ref = rnn_reference(x, w_ih, w_hh, b_ih, b_hh)
    assert out.shape == (B, T, H), out.shape
    # bf16 MXU operands (f32 accumulation) vs. the precision="highest" f32
    # reference give ~1e-2-level deviation after 16 recurrent steps.
    assert jnp.allclose(out, ref, atol=2e-2, rtol=2e-2), (
        "mismatch vs reference: max abs diff = "
        f"{float(jnp.max(jnp.abs(out - ref)))}")

    print("KERNEL_OK")
</pallas_src>

<mosaic_0001>
module attributes {stable_mosaic.version = 11 : i64} {
  func.func @rnn_kernel(%arg0: i32, %arg1: memref<16x8x16xf32, #tpu.memory_space<vmem>>, %arg2: memref<16x128xf32, #tpu.memory_space<vmem>>, %arg3: memref<128x128xf32, #tpu.memory_space<vmem>>, %arg4: memref<1x128xf32, #tpu.memory_space<vmem>>, %arg5: memref<16x8x128xf32, #tpu.memory_space<vmem>>, %arg6: memref<16x8x128xf32, #tpu.memory_space<vmem>>) attributes {dimension_semantics = [#tpu.dimension_semantics<parallel>], iteration_bounds = array<i64: 2>, scalar_prefetch = 0 : i64, scratch_operands = 1 : i64, tpu.core_type = #tpu.core_type<tc>, window_params = [{transform_indices = @transform_0, window_bounds = array<i64: 16, 8, 16>}, {pipeline_mode = #tpu.pipeline_mode<synchronous>, transform_indices = @transform_1, window_bounds = array<i64: 16, 128>}, {pipeline_mode = #tpu.pipeline_mode<synchronous>, transform_indices = @transform_2, window_bounds = array<i64: 128, 128>}, {pipeline_mode = #tpu.pipeline_mode<synchronous>, transform_indices = @transform_3, window_bounds = array<i64: 1, 128>}, {transform_indices = @transform_4, window_bounds = array<i64: 16, 8, 128>}]} {
    %c0 = arith.constant 0 : index
    %c0_0 = arith.constant 0 : index
    %c0_1 = arith.constant 0 : index
    %0 = vector.load %arg1[%c0, %c0_0, %c0_1] : memref<16x8x16xf32, #tpu.memory_space<vmem>>, vector<16x8x16xf32>
    %1 = vector.shape_cast %0 : vector<16x8x16xf32> to vector<128x16xf32>
    %2 = arith.truncf %1 : vector<128x16xf32> to vector<128x16xbf16>
    %c0_2 = arith.constant 0 : index
    %c0_3 = arith.constant 0 : index
    %3 = vector.load %arg2[%c0_2, %c0_3] : memref<16x128xf32, #tpu.memory_space<vmem>>, vector<16x128xf32>
    %4 = arith.truncf %3 : vector<16x128xf32> to vector<16x128xbf16>
    %cst = arith.constant dense<0.000000e+00> : vector<128x128xf32>
    %5 = tpu.matmul %2, %4, %cst {dimension_numbers = #tpu.dot_dimension_numbers<[1], [0], [0], [1], [0, 0, 1, 1], [], []>} : vector<128x16xbf16>, vector<16x128xbf16>, vector<128x128xf32> -> vector<128x128xf32>
    %c0_4 = arith.constant 0 : index
    %c0_5 = arith.constant 0 : index
    %6 = vector.load %arg4[%c0_4, %c0_5] : memref<1x128xf32, #tpu.memory_space<vmem>>, vector<1x128xf32>
    %7 = vector.broadcast %6 : vector<1x128xf32> to vector<128x128xf32>
    %8 = arith.addf %5, %7 : vector<128x128xf32>
    %9 = vector.shape_cast %8 : vector<128x128xf32> to vector<16x8x128xf32>
    %c0_6 = arith.constant 0 : index
    %c0_7 = arith.constant 0 : index
    %c0_8 = arith.constant 0 : index
    %10 = vector.load %arg6[%c0_6, %c0_7, %c0_8] : memref<16x8x128xf32, #tpu.memory_space<vmem>>, vector<16x8x128xf32>
    tpu.vector_store %arg6[%c0_6, %c0_7, %c0_8], %9 {strides = array<i32>} : memref<16x8x128xf32, #tpu.memory_space<vmem>>, vector<16x8x128xf32>,
    %c0_9 = arith.constant 0 : index
    %c0_10 = arith.constant 0 : index
    %11 = vector.load %arg3[%c0_9, %c0_10] : memref<128x128xf32, #tpu.memory_space<vmem>>, vector<128x128xf32>
    %12 = arith.truncf %11 : vector<128x128xf32> to vector<128x128xbf16>
    %cst_11 = arith.constant 0.000000e+00 : f32
    %13 = vector.broadcast %cst_11 : f32 to vector<8x128xf32>
    %c0_i32 = arith.constant 0 : i32
    %14 = arith.index_cast %c0_i32 : i32 to index
    %c0_12 = arith.constant 0 : index
    %c0_13 = arith.constant 0 : index
    %15 = vector.load %arg6[%14, %c0_12, %c0_13] : memref<16x8x128xf32, #tpu.memory_space<vmem>>, vector<1x8x128xf32>
    %16 = vector.shape_cast %15 : vector<1x8x128xf32> to vector<8x128xf32>
    %17 = arith.truncf %13 : vector<8x128xf32> to vector<8x128xbf16>
    %cst_14 = arith.constant dense<0.000000e+00> : vector<8x128xf32>
    %18 = tpu.matmul %17, %12, %cst_14 {dimension_numbers = #tpu.dot_dimension_numbers<[1], [0], [0], [1], [0, 0, 1, 1], [], []>} : vector<8x128xbf16>, vector<128x128xbf16>, vector<8x128xf32> -> vector<8x128xf32>
    %19 = arith.addf %16, %18 : vector<8x128xf32>
    %20 = math.tanh %19 : vector<8x128xf32>
    %21 = arith.index_cast %c0_i32 : i32 to index
    %c0_15 = arith.constant 0 : index
    %c0_16 = arith.constant 0 : index
    %22 = vector.load %arg5[%21, %c0_15, %c0_16] : memref<16x8x128xf32, #tpu.memory_space<vmem>>, vector<1x8x128xf32>
    %23 = vector.shape_cast %22 : vector<1x8x128xf32> to vector<8x128xf32>
    %24 = vector.shape_cast %20 : vector<8x128xf32> to vector<1x8x128xf32>
    tpu.vector_store %arg5[%21, %c0_15, %c0_16], %24 {strides = array<i32>} : memref<16x8x128xf32, #tpu.memory_space<vmem>>, vector<1x8x128xf32>,
    %c1_i32 = arith.constant 1 : i32
    %25 = arith.index_cast %c1_i32 : i32 to index
    %c0_17 = arith.constant 0 : index
    %c0_18 = arith.constant 0 : index
    %26 = vector.load %arg6[%25, %c0_17, %c0_18] : memref<16x8x128xf32, #tpu.memory_space<vmem>>, vector<1x8x128xf32>
    %27 = vector.shape_cast %26 : vector<1x8x128xf32> to vector<8x128xf32>
    %28 = arith.truncf %20 : vector<8x128xf32> to vector<8x128xbf16>
    %cst_19 = arith.constant dense<0.000000e+00> : vector<8x128xf32>
    %29 = tpu.matmul %28, %12, %cst_19 {dimension_numbers = #tpu.dot_dimension_numbers<[1], [0], [0], [1], [0, 0, 1, 1], [], []>} : vector<8x128xbf16>, vector<128x128xbf16>, vector<8x128xf32> -> vector<8x128xf32>
    %30 = arith.addf %27, %29 : vector<8x128xf32>
    %31 = math.tanh %30 : vector<8x128xf32>
    %32 = arith.index_cast %c1_i32 : i32 to index
    %c0_20 = arith.constant 0 : index
    %c0_21 = arith.constant 0 : index
    %33 = vector.load %arg5[%32, %c0_20, %c0_21] : memref<16x8x128xf32, #tpu.memory_space<vmem>>, vector<1x8x128xf32>
    %34 = vector.shape_cast %33 : vector<1x8x128xf32> to vector<8x128xf32>
    %35 = vector.shape_cast %31 : vector<8x128xf32> to vector<1x8x128xf32>
    tpu.vector_store %arg5[%32, %c0_20, %c0_21], %35 {strides = array<i32>} : memref<16x8x128xf32, #tpu.memory_space<vmem>>, vector<1x8x128xf32>,
    %c2_i32 = arith.constant 2 : i32
    %36 = arith.index_cast %c2_i32 : i32 to index
    %c0_22 = arith.constant 0 : index
    %c0_23 = arith.constant 0 : index
    %37 = vector.load %arg6[%36, %c0_22, %c0_23] : memref<16x8x128xf32, #tpu.memory_space<vmem>>, vector<1x8x128xf32>
    %38 = vector.shape_cast %37 : vector<1x8x128xf32> to vector<8x128xf32>
    %39 = arith.truncf %31 : vector<8x128xf32> to vector<8x128xbf16>
    %cst_24 = arith.constant dense<0.000000e+00> : vector<8x128xf32>
    %40 = tpu.matmul %39, %12, %cst_24 {dimension_numbers = #tpu.dot_dimension_numbers<[1], [0], [0], [1], [0, 0, 1, 1], [], []>} : vector<8x128xbf16>, vector<128x128xbf16>, vector<8x128xf32> -> vector<8x128xf32>
    %41 = arith.addf %38, %40 : vector<8x128xf32>
    %42 = math.tanh %41 : vector<8x128xf32>
    %43 = arith.index_cast %c2_i32 : i32 to index
    %c0_25 = arith.constant 0 : index
    %c0_26 = arith.constant 0 : index
    %44 = vector.load %arg5[%43, %c0_25, %c0_26] : memref<16x8x128xf32, #tpu.memory_space<vmem>>, vector<1x8x128xf32>
    %45 = vector.shape_cast %44 : vector<1x8x128xf32> to vector<8x128xf32>
    %46 = vector.shape_cast %42 : vector<8x128xf32> to vector<1x8x128xf32>
    tpu.vector_store %arg5[%43, %c0_25, %c0_26], %46 {strides = array<i32>} : memref<16x8x128xf32, #tpu.memory_space<vmem>>, vector<1x8x128xf32>,
    %c3_i32 = arith.constant 3 : i32
    %47 = arith.index_cast %c3_i32 : i32 to index
    %c0_27 = arith.constant 0 : index
    %c0_28 = arith.constant 0 : index
    %48 = vector.load %arg6[%47, %c0_27, %c0_28] : memref<16x8x128xf32, #tpu.memory_space<vmem>>, vector<1x8x128xf32>
    %49 = vector.shape_cast %48 : vector<1x8x128xf32> to vector<8x128xf32>
    %50 = arith.truncf %42 : vector<8x128xf32> to vector<8x128xbf16>
    %cst_29 = arith.constant dense<0.000000e+00> : vector<8x128xf32>
    %51 = tpu.matmul %50, %12, %cst_29 {dimension_numbers = #tpu.dot_dimension_numbers<[1], [0], [0], [1], [0, 0, 1, 1], [], []>} : vector<8x128xbf16>, vector<128x128xbf16>, vector<8x128xf32> -> vector<8x128xf32>
    %52 = arith.addf %49, %51 : vector<8x128xf32>
    %53 = math.tanh %52 : vector<8x128xf32>
    %54 = arith.index_cast %c3_i32 : i32 to index
    %c0_30 = arith.constant 0 : index
    %c0_31 = arith.constant 0 : index
    %55 = vector.load %arg5[%54, %c0_30, %c0_31] : memref<16x8x128xf32, #tpu.memory_space<vmem>>, vector<1x8x128xf32>
    %56 = vector.shape_cast %55 : vector<1x8x128xf32> to vector<8x128xf32>
    %57 = vector.shape_cast %53 : vector<8x128xf32> to vector<1x8x128xf32>
    tpu.vector_store %arg5[%54, %c0_30, %c0_31], %57 {strides = array<i32>} : memref<16x8x128xf32, #tpu.memory_space<vmem>>, vector<1x8x128xf32>,
    %c4_i32 = arith.constant 4 : i32
    %58 = arith.index_cast %c4_i32 : i32 to index
    %c0_32 = arith.constant 0 : index
    %c0_33 = arith.constant 0 : index
    %59 = vector.load %arg6[%58, %c0_32, %c0_33] : memref<16x8x128xf32, #tpu.memory_space<vmem>>, vector<1x8x128xf32>
    %60 = vector.shape_cast %59 : vector<1x8x128xf32> to vector<8x128xf32>
    %61 = arith.truncf %53 : vector<8x128xf32> to vector<8x128xbf16>
    %cst_34 = arith.constant dense<0.000000e+00> : vector<8x128xf32>
    %62 = tpu.matmul %61, %12, %cst_34 {dimension_numbers = #tpu.dot_dimension_numbers<[1], [0], [0], [1], [0, 0, 1, 1], [], []>} : vector<8x128xbf16>, vector<128x128xbf16>, vector<8x128xf32> -> vector<8x128xf32>
    %63 = arith.addf %60, %62 : vector<8x128xf32>
    %64 = math.tanh %63 : vector<8x128xf32>
    %65 = arith.index_cast %c4_i32 : i32 to index
    %c0_35 = arith.constant 0 : index
    %c0_36 = arith.constant 0 : index
    %66 = vector.load %arg5[%65, %c0_35, %c0_36] : memref<16x8x128xf32, #tpu.memory_space<vmem>>, vector<1x8x128xf32>
    %67 = vector.shape_cast %66 : vector<1x8x128xf32> to vector<8x128xf32>
    %68 = vector.shape_cast %64 : vector<8x128xf32> to vector<1x8x128xf32>
    tpu.vector_store %arg5[%65, %c0_35, %c0_36], %68 {strides = array<i32>} : memref<16x8x128xf32, #tpu.memory_space<vmem>>, vector<1x8x128xf32>,
    %c5_i32 = arith.constant 5 : i32
    %69 = arith.index_cast %c5_i32 : i32 to index
    %c0_37 = arith.constant 0 : index
    %c0_38 = arith.constant 0 : index
    %70 = vector.load %arg6[%69, %c0_37, %c0_38] : memref<16x8x128xf32, #tpu.memory_space<vmem>>, vector<1x8x128xf32>
    %71 = vector.shape_cast %70 : vector<1x8x128xf32> to vector<8x128xf32>
    %72 = arith.truncf %64 : vector<8x128xf32> to vector<8x128xbf16>
    %cst_39 = arith.constant dense<0.000000e+00> : vector<8x128xf32>
    %73 = tpu.matmul %72, %12, %cst_39 {dimension_numbers = #tpu.dot_dimension_numbers<[1], [0], [0], [1], [0, 0, 1, 1], [], []>} : vector<8x128xbf16>, vector<128x128xbf16>, vector<8x128xf32> -> vector<8x128xf32>
    %74 = arith.addf %71, %73 : vector<8x128xf32>
    %75 = math.tanh %74 : vector<8x128xf32>
    %76 = arith.index_cast %c5_i32 : i32 to index
    %c0_40 = arith.constant 0 : index
    %c0_41 = arith.constant 0 : index
    %77 = vector.load %arg5[%76, %c0_40, %c0_41] : memref<16x8x128xf32, #tpu.memory_space<vmem>>, vector<1x8x128xf32>
    %78 = vector.shape_cast %77 : vector<1x8x128xf32> to vector<8x128xf32>
    %79 = vector.shape_cast %75 : vector<8x128xf32> to vector<1x8x128xf32>
    tpu.vector_store %arg5[%76, %c0_40, %c0_41], %79 {strides = array<i32>} : memref<16x8x128xf32, #tpu.memory_space<vmem>>, vector<1x8x128xf32>,
    %c6_i32 = arith.constant 6 : i32
    %80 = arith.index_cast %c6_i32 : i32 to index
    %c0_42 = arith.constant 0 : index
    %c0_43 = arith.constant 0 : index
    %81 = vector.load %arg6[%80, %c0_42, %c0_43] : memref<16x8x128xf32, #tpu.memory_space<vmem>>, vector<1x8x128xf32>
    %82 = vector.shape_cast %81 : vector<1x8x128xf32> to vector<8x128xf32>
    %83 = arith.truncf %75 : vector<8x128xf32> to vector<8x128xbf16>
    %cst_44 = arith.constant dense<0.000000e+00> : vector<8x128xf32>
    %84 = tpu.matmul %83, %12, %cst_44 {dimension_numbers = #tpu.dot_dimension_numbers<[1], [0], [0], [1], [0, 0, 1, 1], [], []>} : vector<8x128xbf16>, vector<128x128xbf16>, vector<8x128xf32> -> vector<8x128xf32>
    %85 = arith.addf %82, %84 : vector<8x128xf32>
    %86 = math.tanh %85 : vector<8x128xf32>
    %87 = arith.index_cast %c6_i32 : i32 to index
    %c0_45 = arith.constant 0 : index
    %c0_46 = arith.constant 0 : index
    %88 = vector.load %arg5[%87, %c0_45, %c0_46] : memref<16x8x128xf32, #tpu.memory_space<vmem>>, vector<1x8x128xf32>
    %89 = vector.shape_cast %88 : vector<1x8x128xf32> to vector<8x128xf32>
    %90 = vector.shape_cast %86 : vector<8x128xf32> to vector<1x8x128xf32>
    tpu.vector_store %arg5[%87, %c0_45, %c0_46], %90 {strides = array<i32>} : memref<16x8x128xf32, #tpu.memory_space<vmem>>, vector<1x8x128xf32>,
    %c7_i32 = arith.constant 7 : i32
    %91 = arith.index_cast %c7_i32 : i32 to index
    %c0_47 = arith.constant 0 : index
    %c0_48 = arith.constant 0 : index
    %92 = vector.load %arg6[%91, %c0_47, %c0_48] : memref<16x8x128xf32, #tpu.memory_space<vmem>>, vector<1x8x128xf32>
    %93 = vector.shape_cast %92 : vector<1x8x128xf32> to vector<8x128xf32>
    %94 = arith.truncf %86 : vector<8x128xf32> to vector<8x128xbf16>
    %cst_49 = arith.constant dense<0.000000e+00> : vector<8x128xf32>
    %95 = tpu.matmul %94, %12, %cst_49 {dimension_numbers = #tpu.dot_dimension_numbers<[1], [0], [0], [1], [0, 0, 1, 1], [], []>} : vector<8x128xbf16>, vector<128x128xbf16>, vector<8x128xf32> -> vector<8x128xf32>
    %96 = arith.addf %93, %95 : vector<8x128xf32>
    %97 = math.tanh %96 : vector<8x128xf32>
    %98 = arith.index_cast %c7_i32 : i32 to index
    %c0_50 = arith.constant 0 : index
    %c0_51 = arith.constant 0 : index
    %99 = vector.load %arg5[%98, %c0_50, %c0_51] : memref<16x8x128xf32, #tpu.memory_space<vmem>>, vector<1x8x128xf32>
    %100 = vector.shape_cast %99 : vector<1x8x128xf32> to vector<8x128xf32>
    %101 = vector.shape_cast %97 : vector<8x128xf32> to vector<1x8x128xf32>
    tpu.vector_store %arg5[%98, %c0_50, %c0_51], %101 {strides = array<i32>} : memref<16x8x128xf32, #tpu.memory_space<vmem>>, vector<1x8x128xf32>,
    %c8_i32 = arith.constant 8 : i32
    %102 = arith.index_cast %c8_i32 : i32 to index
    %c0_52 = arith.constant 0 : index
    %c0_53 = arith.constant 0 : index
    %103 = vector.load %arg6[%102, %c0_52, %c0_53] : memref<16x8x128xf32, #tpu.memory_space<vmem>>, vector<1x8x128xf32>
    %104 = vector.shape_cast %103 : vector<1x8x128xf32> to vector<8x128xf32>
    %105 = arith.truncf %97 : vector<8x128xf32> to vector<8x128xbf16>
    %cst_54 = arith.constant dense<0.000000e+00> : vector<8x128xf32>
    %106 = tpu.matmul %105, %12, %cst_54 {dimension_numbers = #tpu.dot_dimension_numbers<[1], [0], [0], [1], [0, 0, 1, 1], [], []>} : vector<8x128xbf16>, vector<128x128xbf16>, vector<8x128xf32> -> vector<8x128xf32>
    %107 = arith.addf %104, %106 : vector<8x128xf32>
    %108 = math.tanh %107 : vector<8x128xf32>
    %109 = arith.index_cast %c8_i32 : i32 to index
    %c0_55 = arith.constant 0 : index
    %c0_56 = arith.constant 0 : index
    %110 = vector.load %arg5[%109, %c0_55, %c0_56] : memref<16x8x128xf32, #tpu.memory_space<vmem>>, vector<1x8x128xf32>
    %111 = vector.shape_cast %110 : vector<1x8x128xf32> to vector<8x128xf32>
    %112 = vector.shape_cast %108 : vector<8x128xf32> to vector<1x8x128xf32>
    tpu.vector_store %arg5[%109, %c0_55, %c0_56], %112 {strides = array<i32>} : memref<16x8x128xf32, #tpu.memory_space<vmem>>, vector<1x8x128xf32>,
    %c9_i32 = arith.constant 9 : i32
    %113 = arith.index_cast %c9_i32 : i32 to index
    %c0_57 = arith.constant 0 : index
    %c0_58 = arith.constant 0 : index
    %114 = vector.load %arg6[%113, %c0_57, %c0_58] : memref<16x8x128xf32, #tpu.memory_space<vmem>>, vector<1x8x128xf32>
    %115 = vector.shape_cast %114 : vector<1x8x128xf32> to vector<8x128xf32>
    %116 = arith.truncf %108 : vector<8x128xf32> to vector<8x128xbf16>
    %cst_59 = arith.constant dense<0.000000e+00> : vector<8x128xf32>
    %117 = tpu.matmul %116, %12, %cst_59 {dimension_numbers = #tpu.dot_dimension_numbers<[1], [0], [0], [1], [0, 0, 1, 1], [], []>} : vector<8x128xbf16>, vector<128x128xbf16>, vector<8x128xf32> -> vector<8x128xf32>
    %118 = arith.addf %115, %117 : vector<8x128xf32>
    %119 = math.tanh %118 : vector<8x128xf32>
    %120 = arith.index_cast %c9_i32 : i32 to index
    %c0_60 = arith.constant 0 : index
    %c0_61 = arith.constant 0 : index
    %121 = vector.load %arg5[%120, %c0_60, %c0_61] : memref<16x8x128xf32, #tpu.memory_space<vmem>>, vector<1x8x128xf32>
    %122 = vector.shape_cast %121 : vector<1x8x128xf32> to vector<8x128xf32>
    %123 = vector.shape_cast %119 : vector<8x128xf32> to vector<1x8x128xf32>
    tpu.vector_store %arg5[%120, %c0_60, %c0_61], %123 {strides = array<i32>} : memref<16x8x128xf32, #tpu.memory_space<vmem>>, vector<1x8x128xf32>,
    %c10_i32 = arith.constant 10 : i32
    %124 = arith.index_cast %c10_i32 : i32 to index
    %c0_62 = arith.constant 0 : index
    %c0_63 = arith.constant 0 : index
    %125 = vector.load %arg6[%124, %c0_62, %c0_63] : memref<16x8x128xf32, #tpu.memory_space<vmem>>, vector<1x8x128xf32>
    %126 = vector.shape_cast %125 : vector<1x8x128xf32> to vector<8x128xf32>
    %127 = arith.truncf %119 : vector<8x128xf32> to vector<8x128xbf16>
    %cst_64 = arith.constant dense<0.000000e+00> : vector<8x128xf32>
    %128 = tpu.matmul %127, %12, %cst_64 {dimension_numbers = #tpu.dot_dimension_numbers<[1], [0], [0], [1], [0, 0, 1, 1], [], []>} : vector<8x128xbf16>, vector<128x128xbf16>, vector<8x128xf32> -> vector<8x128xf32>
    %129 = arith.addf %126, %128 : vector<8x128xf32>
    %130 = math.tanh %129 : vector<8x128xf32>
    %131 = arith.index_cast %c10_i32 : i32 to index
    %c0_65 = arith.constant 0 : index
    %c0_66 = arith.constant 0 : index
    %132 = vector.load %arg5[%131, %c0_65, %c0_66] : memref<16x8x128xf32, #tpu.memory_space<vmem>>, vector<1x8x128xf32>
    %133 = vector.shape_cast %132 : vector<1x8x128xf32> to vector<8x128xf32>
    %134 = vector.shape_cast %130 : vector<8x128xf32> to vector<1x8x128xf32>
    tpu.vector_store %arg5[%131, %c0_65, %c0_66], %134 {strides = array<i32>} : memref<16x8x128xf32, #tpu.memory_space<vmem>>, vector<1x8x128xf32>,
    %c11_i32 = arith.constant 11 : i32
    %135 = arith.index_cast %c11_i32 : i32 to index
    %c0_67 = arith.constant 0 : index
    %c0_68 = arith.constant 0 : index
    %136 = vector.load %arg6[%135, %c0_67, %c0_68] : memref<16x8x128xf32, #tpu.memory_space<vmem>>, vector<1x8x128xf32>
    %137 = vector.shape_cast %136 : vector<1x8x128xf32> to vector<8x128xf32>
    %138 = arith.truncf %130 : vector<8x128xf32> to vector<8x128xbf16>
    %cst_69 = arith.constant dense<0.000000e+00> : vector<8x128xf32>
    %139 = tpu.matmul %138, %12, %cst_69 {dimension_numbers = #tpu.dot_dimension_numbers<[1], [0], [0], [1], [0, 0, 1, 1], [], []>} : vector<8x128xbf16>, vector<128x128xbf16>, vector<8x128xf32> -> vector<8x128xf32>
    %140 = arith.addf %137, %139 : vector<8x128xf32>
    %141 = math.tanh %140 : vector<8x128xf32>
    %142 = arith.index_cast %c11_i32 : i32 to index
    %c0_70 = arith.constant 0 : index
    %c0_71 = arith.constant 0 : index
    %143 = vector.load %arg5[%142, %c0_70, %c0_71] : memref<16x8x128xf32, #tpu.memory_space<vmem>>, vector<1x8x128xf32>
    %144 = vector.shape_cast %143 : vector<1x8x128xf32> to vector<8x128xf32>
    %145 = vector.shape_cast %141 : vector<8x128xf32> to vector<1x8x128xf32>
    tpu.vector_store %arg5[%142, %c0_70, %c0_71], %145 {strides = array<i32>} : memref<16x8x128xf32, #tpu.memory_space<vmem>>, vector<1x8x128xf32>,
    %c12_i32 = arith.constant 12 : i32
    %146 = arith.index_cast %c12_i32 : i32 to index
    %c0_72 = arith.constant 0 : index
    %c0_73 = arith.constant 0 : index
    %147 = vector.load %arg6[%146, %c0_72, %c0_73] : memref<16x8x128xf32, #tpu.memory_space<vmem>>, vector<1x8x128xf32>
    %148 = vector.shape_cast %147 : vector<1x8x128xf32> to vector<8x128xf32>
    %149 = arith.truncf %141 : vector<8x128xf32> to vector<8x128xbf16>
    %cst_74 = arith.constant dense<0.000000e+00> : vector<8x128xf32>
    %150 = tpu.matmul %149, %12, %cst_74 {dimension_numbers = #tpu.dot_dimension_numbers<[1], [0], [0], [1], [0, 0, 1, 1], [], []>} : vector<8x128xbf16>, vector<128x128xbf16>, vector<8x128xf32> -> vector<8x128xf32>
    %151 = arith.addf %148, %150 : vector<8x128xf32>
    %152 = math.tanh %151 : vector<8x128xf32>
    %153 = arith.index_cast %c12_i32 : i32 to index
    %c0_75 = arith.constant 0 : index
    %c0_76 = arith.constant 0 : index
    %154 = vector.load %arg5[%153, %c0_75, %c0_76] : memref<16x8x128xf32, #tpu.memory_space<vmem>>, vector<1x8x128xf32>
    %155 = vector.shape_cast %154 : vector<1x8x128xf32> to vector<8x128xf32>
    %156 = vector.shape_cast %152 : vector<8x128xf32> to vector<1x8x128xf32>
    tpu.vector_store %arg5[%153, %c0_75, %c0_76], %156 {strides = array<i32>} : memref<16x8x128xf32, #tpu.memory_space<vmem>>, vector<1x8x128xf32>,
    %c13_i32 = arith.constant 13 : i32
    %157 = arith.index_cast %c13_i32 : i32 to index
    %c0_77 = arith.constant 0 : index
    %c0_78 = arith.constant 0 : index
    %158 = vector.load %arg6[%157, %c0_77, %c0_78] : memref<16x8x128xf32, #tpu.memory_space<vmem>>, vector<1x8x128xf32>
    %159 = vector.shape_cast %158 : vector<1x8x128xf32> to vector<8x128xf32>
    %160 = arith.truncf %152 : vector<8x128xf32> to vector<8x128xbf16>
    %cst_79 = arith.constant dense<0.000000e+00> : vector<8x128xf32>
    %161 = tpu.matmul %160, %12, %cst_79 {dimension_numbers = #tpu.dot_dimension_numbers<[1], [0], [0], [1], [0, 0, 1, 1], [], []>} : vector<8x128xbf16>, vector<128x128xbf16>, vector<8x128xf32> -> vector<8x128xf32>
    %162 = arith.addf %159, %161 : vector<8x128xf32>
    %163 = math.tanh %162 : vector<8x128xf32>
    %164 = arith.index_cast %c13_i32 : i32 to index
    %c0_80 = arith.constant 0 : index
    %c0_81 = arith.constant 0 : index
    %165 = vector.load %arg5[%164, %c0_80, %c0_81] : memref<16x8x128xf32, #tpu.memory_space<vmem>>, vector<1x8x128xf32>
    %166 = vector.shape_cast %165 : vector<1x8x128xf32> to vector<8x128xf32>
    %167 = vector.shape_cast %163 : vector<8x128xf32> to vector<1x8x128xf32>
    tpu.vector_store %arg5[%164, %c0_80, %c0_81], %167 {strides = array<i32>} : memref<16x8x128xf32, #tpu.memory_space<vmem>>, vector<1x8x128xf32>,
    %c14_i32 = arith.constant 14 : i32
    %168 = arith.index_cast %c14_i32 : i32 to index
    %c0_82 = arith.constant 0 : index
    %c0_83 = arith.constant 0 : index
    %169 = vector.load %arg6[%168, %c0_82, %c0_83] : memref<16x8x128xf32, #tpu.memory_space<vmem>>, vector<1x8x128xf32>
    %170 = vector.shape_cast %169 : vector<1x8x128xf32> to vector<8x128xf32>
    %171 = arith.truncf %163 : vector<8x128xf32> to vector<8x128xbf16>
    %cst_84 = arith.constant dense<0.000000e+00> : vector<8x128xf32>
    %172 = tpu.matmul %171, %12, %cst_84 {dimension_numbers = #tpu.dot_dimension_numbers<[1], [0], [0], [1], [0, 0, 1, 1], [], []>} : vector<8x128xbf16>, vector<128x128xbf16>, vector<8x128xf32> -> vector<8x128xf32>
    %173 = arith.addf %170, %172 : vector<8x128xf32>
    %174 = math.tanh %173 : vector<8x128xf32>
    %175 = arith.index_cast %c14_i32 : i32 to index
    %c0_85 = arith.constant 0 : index
    %c0_86 = arith.constant 0 : index
    %176 = vector.load %arg5[%175, %c0_85, %c0_86] : memref<16x8x128xf32, #tpu.memory_space<vmem>>, vector<1x8x128xf32>
    %177 = vector.shape_cast %176 : vector<1x8x128xf32> to vector<8x128xf32>
    %178 = vector.shape_cast %174 : vector<8x128xf32> to vector<1x8x128xf32>
    tpu.vector_store %arg5[%175, %c0_85, %c0_86], %178 {strides = array<i32>} : memref<16x8x128xf32, #tpu.memory_space<vmem>>, vector<1x8x128xf32>,
    %c15_i32 = arith.constant 15 : i32
    %179 = arith.index_cast %c15_i32 : i32 to index
    %c0_87 = arith.constant 0 : index
    %c0_88 = arith.constant 0 : index
    %180 = vector.load %arg6[%179, %c0_87, %c0_88] : memref<16x8x128xf32, #tpu.memory_space<vmem>>, vector<1x8x128xf32>
    %181 = vector.shape_cast %180 : vector<1x8x128xf32> to vector<8x128xf32>
    %182 = arith.truncf %174 : vector<8x128xf32> to vector<8x128xbf16>
    %cst_89 = arith.constant dense<0.000000e+00> : vector<8x128xf32>
    %183 = tpu.matmul %182, %12, %cst_89 {dimension_numbers = #tpu.dot_dimension_numbers<[1], [0], [0], [1], [0, 0, 1, 1], [], []>} : vector<8x128xbf16>, vector<128x128xbf16>, vector<8x128xf32> -> vector<8x128xf32>
    %184 = arith.addf %181, %183 : vector<8x128xf32>
    %185 = math.tanh %184 : vector<8x128xf32>
    %186 = arith.index_cast %c15_i32 : i32 to index
    %c0_90 = arith.constant 0 : index
    %c0_91 = arith.constant 0 : index
    %187 = vector.load %arg5[%186, %c0_90, %c0_91] : memref<16x8x128xf32, #tpu.memory_space<vmem>>, vector<1x8x128xf32>
    %188 = vector.shape_cast %187 : vector<1x8x128xf32> to vector<8x128xf32>
    %189 = vector.shape_cast %185 : vector<8x128xf32> to vector<1x8x128xf32>
    tpu.vector_store %arg5[%186, %c0_90, %c0_91], %189 {strides = array<i32>} : memref<16x8x128xf32, #tpu.memory_space<vmem>>, vector<1x8x128xf32>,
    %c16_i32 = arith.constant 16 : i32
    return
  }
  func.func @transform_0(%arg0: i32) -> (i32, i32, i32) {
    %c0_i32 = arith.constant 0 : i32
    %c0_i32_0 = arith.constant 0 : i32
    %c0_i32_1 = arith.constant 0 : i32
    return %c0_i32, %arg0, %c0_i32_0 : i32, i32, i32
  }
  func.func @transform_1(%arg0: i32) -> (i32, i32) {
    %c0_i32 = arith.constant 0 : i32
    %c0_i32_0 = arith.constant 0 : i32
    %c0_i32_1 = arith.constant 0 : i32
    return %c0_i32, %c0_i32_0 : i32, i32
  }
  func.func @transform_2(%arg0: i32) -> (i32, i32) {
    %c0_i32 = arith.constant 0 : i32
    %c0_i32_0 = arith.constant 0 : i32
    %c0_i32_1 = arith.constant 0 : i32
    return %c0_i32, %c0_i32_0 : i32, i32
  }
  func.func @transform_3(%arg0: i32) -> (i32, i32) {
    %c0_i32 = arith.constant 0 : i32
    %c0_i32_0 = arith.constant 0 : i32
    %c0_i32_1 = arith.constant 0 : i32
    return %c0_i32, %c0_i32_0 : i32, i32
  }
  func.func @transform_4(%arg0: i32) -> (i32, i32, i32) {
    %c0_i32 = arith.constant 0 : i32
    %c0_i32_0 = arith.constant 0 : i32
    %c0_i32_1 = arith.constant 0 : i32
    return %c0_i32, %arg0, %c0_i32_0 : i32, i32, i32
  }
}

</mosaic_0001>

<bundles_post_ra>
// kernel: simple_rnn_block.1
= control target key start
LH: loop header
LB: loop body
LE: loop exit
PB: predicated region body
PF: predicated region fallthrough
CT: control target
= control target key end

     0   :  { %s2028_s15 = smov 0   ;;  %s2030_s16 = smov 0   ;;  %s2591_s0 = inlined_call_operand.vmem [shape: f32[16,16,16], index: 0, kind: input, shape index: {}]   ;;  %s2592_s1 = inlined_call_operand.vmem [shape: f32[16,128], index: 1, kind: input, shape index: {}]   ;;  %s2593_s2 = inlined_call_operand.vmem [shape: f32[128,128], index: 2, kind: input, shape index: {}]   ;;  %s2594_s3 = inlined_call_operand.vmem [shape: f32[1,128], index: 3, kind: input, shape index: {}]   ;;  %s2595_s4 = inlined_call_operand.vmem [shape: f32[16,16,128], index: 4, kind: output, shape index: {}]  }
   0x1   :  { %s2032_s17 = smov 0  }
   0x2 LB: > { %s1389_s18 = sadd.s32 4294967295, %s1998_s17   ;;  %s2045_s19 = sadd.s32 1, %s1998_s17   ;;  %s1998_s17 = sphi %s2032_s17, %s2599_s17   ;;  %s1994_s16 = sphi %s2030_s16, %s2598_s16   ;;  %s1990_s15 = sphi %s2028_s15, %s2597_s15  }
   0x3   : > { %s18_s20 = ssub.s32 %s1998_s17, %s2045_s19  ;;  %s21_s21 = sadd.s32 1, %s1994_s16 }
   0x4   : > { %p19_p0 = scmp.eq.s32.totalorder %s18_s20, 0  ;;  %p28_p1 = scmp.ne.s32.totalorder %s1994_s16, %s1990_s15 }
   0x5   : > { %p29_p2 = scmp.eq.s32.totalorder %s1998_s17, 0  ;;  %p121_p3 = scmp.eq.s32.totalorder %s1389_s18, 1 }
   0x6   : > { %s2056_s22 = scalar_select %p19_p0, %s1994_s16, %s21_s21  }
   0x7   : > { %p30_p4 = por %p29_p2, %p28_p1  ;;  %p2058_p5 = por %p121_p3, %p28_p1 }
   0x8   : > { %p1392_p6 = scmp.ge.s32.totalorder %s1998_s17, 2 }
   0xa   : > { %152 = sbr.rel (%p1392_p6) target bundleno = 29 (0x1d), region = 28 }
  0x11   : > { %155 = sbr.rel (!%p30_p4) target bundleno = 29 (0x1d), region = 32  ;;  %s157_s24 = sand.u32 (%p30_p4), 1, %s1994_s16  }
  0x12   : > { %s1394_s25 = sshll.u32 (%p30_p4), %s1998_s17, 3  ;;  %s1393_s26 = sshll.u32 (%p30_p4), %s157_s24, 7 }
  0x13   : > { %s2068_s29 = scalar_lea.vmem (%p30_p4), %s2591_s0, %s1394_s25  ;;  %s159_s30 = scalar_lea.vmem (%p30_p4), [#allocation3], %s1393_s26 }
  0x14   : > { %v219_v0 = vld [vmem:[%s2068_s29] sm:$0xff] (%p30_p4)  ;;  %v221_v1 = vld [vmem:[%s2068_s29 + $0x10] sm:$0xff] (%p30_p4) }
  0x15   : > { %v223_v2 = vld [vmem:[%s2068_s29 + $0x20] sm:$0xff] (%p30_p4)  ;;  %220 = vst [vmem:[%s159_s30] sm:$0xff] (%p30_p4), %v219_v0  ;;  %222 = vst [vmem:[%s159_s30 + $0x8] sm:$0xff] (%p30_p4), %v221_v1  ;;  %v225_v3 = vld [vmem:[%s2068_s29 + $0x30] sm:$0xff] (%p30_p4) }
  0x16   : > { %224 = vst [vmem:[%s159_s30 + $0x10] sm:$0xff] (%p30_p4), %v223_v2  ;;  %v227_v4 = vld [vmem:[%s2068_s29 + $0x40] sm:$0xff] (%p30_p4)  ;;  %v229_v5 = vld [vmem:[%s2068_s29 + $0x50] sm:$0xff] (%p30_p4)  ;;  %226 = vst [vmem:[%s159_s30 + $0x18] sm:$0xff] (%p30_p4), %v225_v3 }
  0x17   : > { %228 = vst [vmem:[%s159_s30 + $0x20] sm:$0xff] (%p30_p4), %v227_v4  ;;  %230 = vst [vmem:[%s159_s30 + $0x28] sm:$0xff] (%p30_p4), %v229_v5  ;;  %v231_v6 = vld [vmem:[%s2068_s29 + $0x60] sm:$0xff] (%p30_p4)  ;;  %v233_v7 = vld [vmem:[%s2068_s29 + $0x70] sm:$0xff] (%p30_p4) }
  0x18   : > { %v235_v8 = vld [vmem:[%s2068_s29 + $0x80] sm:$0xff]  ;;  %232 = vst [vmem:[%s159_s30 + $0x30] sm:$0xff] %v231_v6  ;;  %234 = vst [vmem:[%s159_s30 + $0x38] sm:$0xff] %v233_v7  ;;  %v237_v9 = vld [vmem:[%s2068_s29 + $0x90] sm:$0xff] }
  0x19   : > { %236 = vst [vmem:[%s159_s30 + $0x40] sm:$0xff] %v235_v8  ;;  %v239_v10 = vld [vmem:[%s2068_s29 + $0xa0] sm:$0xff]  ;;  %v241_v11 = vld [vmem:[%s2068_s29 + $0xb0] sm:$0xff]  ;;  %238 = vst [vmem:[%s159_s30 + $0x48] sm:$0xff] %v237_v9 }
  0x1a   : > { %240 = vst [vmem:[%s159_s30 + $0x50] sm:$0xff] %v239_v10  ;;  %242 = vst [vmem:[%s159_s30 + $0x58] sm:$0xff] %v241_v11  ;;  %v243_v12 = vld [vmem:[%s2068_s29 + $0xc0] sm:$0xff]  ;;  %v245_v13 = vld [vmem:[%s2068_s29 + $0xd0] sm:$0xff] }
  0x1b   : > { %v247_v14 = vld [vmem:[%s2068_s29 + $0xe0] sm:$0xff]  ;;  %244 = vst [vmem:[%s159_s30 + $0x60] sm:$0xff] %v243_v12  ;;  %246 = vst [vmem:[%s159_s30 + $0x68] sm:$0xff] %v245_v13  ;;  %v249_v15 = vld [vmem:[%s2068_s29 + $0xf0] sm:$0xff] }
  0x1c   : > { %248 = vst [vmem:[%s159_s30 + $0x70] sm:$0xff] %v247_v14  ;;  %250 = vst [vmem:[%s159_s30 + $0x78] sm:$0xff] %v249_v15 }
  0x1d PF: > { %p1395_p7 = scmp.ge.s32.totalorder %s1998_s17, 1  ;;  %p255_p8 = scmp.lt.s32.totalorder %s1998_s17, 3 }
  0x1f   : > { %p256_p9 = pnand %p1395_p7, %p255_p8 }
  0x20   : > { %v459_v16 = vld [vmem:[%s2593_s2] sm:$0xff] (!%p256_p9)  ;;  %v460_v17 = vld [vmem:[%s2593_s2 + $0x8] sm:$0xff] (!%p256_p9)  ;;  %v461_v18 = vld [vmem:[%s2593_s2 + $0x10] sm:$0xff] (!%p256_p9)  ;;  %s262_s11 = sand.u32 (!%p256_p9), 1, %s1990_s15   ;;  %v2000_v19 = vmov (!%p256_p9), 0.0   ;;  %vm2001_vm0 = vmmov (!%p256_p9), 0  }
  0x21   : > { %259 = sbr.rel (%p256_p9) target bundleno = 3705 (0xe79), region = 70  ;;  %1597 = vmatprep.subr.bf16.mxu1 (!%p256_p9), %v2000_v19  ;;  %v2099_v20 = vpack.c.bf16 (!%p256_p9), %v460_v17, %v459_v16  ;;  %v462_v21 = vld [vmem:[%s2593_s2 + $0x18] sm:$0xff] (!%p256_p9)  ;;  %s2104_s14 = sshll.u32 (!%p256_p9), %s262_s11, 7  ;;  %1613 = vmatprep.mubr.msk.bf16.mxu1 (!%p256_p9), %vm2001_vm0, %v2000_v19  ;;  %v463_v23 = vld [vmem:[%s2593_s2 + $0x20] sm:$0xff] (!%p256_p9)  ;;  %v464_v24 = vld [vmem:[%s2593_s2 + $0x28] sm:$0xff] (!%p256_p9)  ;;  %vm321_vm1 = vcmask (!%p256_p9), 130048  }
  0x22   : > { %v2109_v22 = vpack.c.bf16 (!%p256_p9), %v462_v21, %v461_v18  ;;  %v311_v25 = vld [vmem:[%s2592_s1] sm:$0xff] (!%p256_p9)  ;;  %v312_v26 = vld [vmem:[%s2592_s1 + $0x8] sm:$0xff] (!%p256_p9)  ;;  %s2125_s29 = scalar_lea.vmem (!%p256_p9), [#allocation3], %s2104_s14  ;;  %v2132_v33 = vpack.c.bf16 (!%p256_p9), %v464_v24, %v463_v23  ;;  %v465_v37 = vld [vmem:[%s2593_s2 + $0x30] sm:$0xff] (!%p256_p9)  ;;  %v2002_v56 = vmov (!%p256_p9), 0   ;;  %s2263_s7 = scalar_lea.vmem (!%p256_p9), [#allocation4], %s2104_s14 }
  0x23   : > { %1598 = vmatpush3.bf16.msra.mxu1 (!%p256_p9), %v2099_v20  ;;  %v287_v27 = vld [vmem:[%s2125_s29] sm:$0xff] (!%p256_p9)  ;;  %v313_v28 = vpack.c.bf16 (!%p256_p9), %v312_v26, %v311_v25  ;;  %v288_v29 = vld [vmem:[%s2125_s29 + $0x8] sm:$0xff] (!%p256_p9)  ;;  %v289_v31 = vld [vmem:[%s2125_s29 + $0x10] sm:$0xff] (!%p256_p9) }
  0x24   : > { %1599 = vmatprep.subr.bf16.mxu1 (!%p256_p9), %v2000_v19  ;;  %v303_v30 = vpack.c.bf16 (!%p256_p9), %v288_v29, %v287_v27  ;;  %v290_v32 = vld [vmem:[%s2125_s29 + $0x18] sm:$0xff] (!%p256_p9)  ;;  %v291_v35 = vld [vmem:[%s2125_s29 + $0x20] sm:$0xff] (!%p256_p9)  ;;  %v292_v36 = vld [vmem:[%s2125_s29 + $0x28] sm:$0xff] (!%p256_p9) }
  0x25   : > { %1579 = vmatprep.subr.bf16.mxu0 (!%p256_p9), %v313_v28  ;;  %v304_v34 = vpack.c.bf16 (!%p256_p9), %v290_v32, %v289_v31  ;;  %v466_v38 = vld [vmem:[%s2593_s2 + $0x38] sm:$0xff] (!%p256_p9)  ;;  %v305_v39 = vpack.c.bf16 (!%p256_p9), %v292_v36, %v291_v35  ;;  %v467_v41 = vld [vmem:[%s2593_s2 + $0x40] sm:$0xff] (!%p256_p9)  ;;  %v468_v42 = vld [vmem:[%s2593_s2 + $0x48] sm:$0xff] (!%p256_p9) }
  0x26   : > { %1580 = vmatpush3.bf16.msra.mxu0 (!%p256_p9), %v313_v28  ;;  %1581 = vmatprep.mubr.msk.bf16.mxu0 (!%p256_p9), %vm321_vm1, %v303_v30  ;;  %v2146_v40 = vpack.c.bf16 (!%p256_p9), %v466_v38, %v465_v37  ;;  %v293_v43 = vld [vmem:[%s2125_s29 + $0x30] sm:$0xff] (!%p256_p9)  ;;  %v294_v44 = vld [vmem:[%s2125_s29 + $0x38] sm:$0xff] (!%p256_p9)  ;;  %v2162_v45 = vpack.c.bf16 (!%p256_p9), %v468_v42, %v467_v41  ;;  %v471_v50 = vld [vmem:[%s2593_s2 + $0x60] sm:$0xff] (!%p256_p9) }
  0x27   : > { %1600 = vmatpush3.bf16.msra.mxu1 (!%p256_p9), %v2109_v22  ;;  %1617 = vmatprep.subr.bf16.mxu0 (!%p256_p9), %v2000_v19  ;;  %v306_v46 = vpack.c.bf16 (!%p256_p9), %v294_v44, %v293_v43  ;;  %v469_v47 = vld [vmem:[%s2593_s2 + $0x50] sm:$0xff] (!%p256_p9)  ;;  %v470_v48 = vld [vmem:[%s2593_s2 + $0x58] sm:$0xff] (!%p256_p9)  ;;  %v472_v51 = vld [vmem:[%s2593_s2 + $0x68] sm:$0xff] (!%p256_p9) }
  0x28   : > { %1601 = vmatprep.subr.bf16.mxu1 %v2000_v19  ;;  %v2174_v49 = vpack.c.bf16 %v470_v48, %v469_v47  ;;  %v2187_v52 = vpack.c.bf16 %v472_v51, %v471_v50  ;;  %v473_v53 = vld [vmem:[%s2593_s2 + $0x70] sm:$0xff]  ;;  %v474_v54 = vld [vmem:[%s2593_s2 + $0x78] sm:$0xff]  ;;  %v295_v57 = vld [vmem:[%s2125_s29 + $0x40] sm:$0xff]  ;;  %s1423_s14 = sshll.u32 (%p2058_p5), %s1389_s18, 3 }
  0x29   : > { %1582 = vmatmul.mubr.msk.bf16.vlgmr.msra.gmra.mrb[0].mxu0 %vm321_vm1, %v304_v34  ;;  %v2199_v55 = vpack.c.bf16 %v474_v54, %v473_v53  ;;  %v296_v58 = vld [vmem:[%s2125_s29 + $0x48] sm:$0xff]  ;;  %v297_v60 = vld [vmem:[%s2125_s29 + $0x50] sm:$0xff]  ;;  %v298_v61 = vld [vmem:[%s2125_s29 + $0x58] sm:$0xff]  ;;  %s1240_s23 = scalar_lea.vmem (%p2058_p5), %s2595_s4, %s1423_s14 }
  0x2a   : > { %1618 = vmatpush3.bf16.msra.mxu0 %v2099_v20  ;;  %1585 = vmatprep.mubr.msk.bf16.mxu0 %vm321_vm1, %v305_v39  ;;  %v307_v59 = vpack.c.bf16 %v296_v58, %v295_v57  ;;  %v308_v62 = vpack.c.bf16 %v298_v61, %v297_v60  ;;  %v299_v63 = vld [vmem:[%s2125_s29 + $0x60] sm:$0xff]  ;;  %v300_v0 = vld [vmem:[%s2125_s29 + $0x68] sm:$0xff]  ;;  %v301_v2 = vld [vmem:[%s2125_s29 + $0x70] sm:$0xff] }
  0x2b   : > { %1602 = vmatpush3.bf16.msra.mxu1 %v2132_v33  ;;  %1619 = vmatprep.subr.bf16.mxu0 %v2000_v19  ;;  %v309_v1 = vpack.c.bf16 %v300_v0, %v299_v63  ;;  %v302_v3 = vld [vmem:[%s2125_s29 + $0x78] sm:$0xff]  ;;  %v2259_v13 = vld [vmem:[%s2594_s3] ss:$0 sm:$0xff] }
  0x2c   : > { %1603 = vmatprep.subr.bf16.mxu1 %v2000_v19  ;;  %v310_v4 = vpack.c.bf16 %v302_v3, %v301_v2 }
  0x2e   : > { %1620 = vmatpush3.bf16.msra.mxu0 %v2109_v22 }
  0x2f   : > { %1604 = vmatpush3.bf16.msra.mxu1 %v2146_v40  ;;  %1621 = vmatprep.subr.bf16.mxu0 %v2000_v19 }
  0x30   : > { %1605 = vmatprep.subr.bf16.mxu1 %v2000_v19 }
  0x31   : > { %1586 = vmatmul.mubr.msk.bf16.gmra.mrb[4].mxu0 %vm321_vm1, %v306_v46 }
  0x32   : > { %1622 = vmatpush3.bf16.msra.mxu0 %v2132_v33  ;;  %1589 = vmatprep.mubr.msk.bf16.mxu0 %vm321_vm1, %v307_v59 }
  0x33   : > { %1606 = vmatpush3.bf16.msra.mxu1 %v2162_v45  ;;  %1623 = vmatprep.subr.bf16.mxu0 %v2000_v19 }
  0x34   : > { %1607 = vmatprep.subr.bf16.mxu1 %v2000_v19 }
  0x36   : > { %1624 = vmatpush3.bf16.msra.mxu0 %v2146_v40 }
  0x37   : > { %1608 = vmatpush3.bf16.msra.mxu1 %v2174_v49  ;;  %1625 = vmatprep.subr.bf16.mxu0 %v2000_v19 }
  0x38   : > { %1609 = vmatprep.subr.bf16.mxu1 %v2000_v19 }
  0x39   : > { %1590 = vmatmul.mubr.msk.bf16.gmra.mrb[8].mxu0 %vm321_vm1, %v308_v62 }
  0x3a   : > { %1626 = vmatpush3.bf16.msra.mxu0 %v2162_v45  ;;  %1593 = vmatprep.mubr.msk.bf16.mxu0 %vm321_vm1, %v309_v1 }
  0x3b   : > { %1610 = vmatpush3.bf16.msra.mxu1 %v2187_v52  ;;  %1627 = vmatprep.subr.bf16.mxu0 %v2000_v19 }
  0x3c   : > { %1611 = vmatprep.subr.bf16.mxu1 %v2000_v19 }
  0x3e   : > { %1628 = vmatpush3.bf16.msra.mxu0 %v2174_v49 }
  0x3f   : > { %1612 = vmatpush3.bf16.msra.mxu1 %v2199_v55  ;;  %1629 = vmatprep.subr.bf16.mxu0 %v2000_v19 }
  0x40   : > { %1637 = vmatprep.subr.bf16.mxu1 %v2000_v19 }
  0x41   : > { %1594 = vmatmul.mubr.msk.bf16.gmra.mrb[12].mxu0 %vm321_vm1, %v310_v4 }
  0x42   : > { %1614 = vmatmul.mubr.bf16.vlgmr.msra.gmra.mrb[0].mxu1 %v2002_v56  ;;  %1630 = vmatpush3.bf16.msra.mxu0 %v2187_v52 }
  0x43   : > { %1638 = vmatpush3.bf16.msra.mxu1 %v2099_v20  ;;  %1653 = vmatprep.mubr.msk.bf16.mxu1 %vm2001_vm0, %v2000_v19 }
  0x44   : > { %1639 = vmatprep.subr.bf16.mxu1 %v2000_v19  ;;  %1631 = vmatprep.subr.bf16.mxu0 %v2000_v19 }
  0x45   : > { %1633 = vmatprep.mubr.msk.bf16.mxu0 %vm2001_vm0, %v2000_v19 }
  0x46   : > { %1632 = vmatpush3.bf16.msra.mxu0 %v2199_v55 }
  0x47   : > { %1640 = vmatpush3.bf16.msra.mxu1 %v2109_v22  ;;  %1657 = vmatprep.subr.bf16.mxu0 %v2000_v19 }
  0x48   : > { %1641 = vmatprep.subr.bf16.mxu1 %v2000_v19 }
  0x4b   : > { %1642 = vmatpush3.bf16.msra.mxu1 %v2132_v33 }
  0x4c   : > { %1643 = vmatprep.subr.bf16.mxu1 %v2000_v19 }
  0x4f   : > { %1644 = vmatpush3.bf16.msra.mxu1 %v2146_v40 }
  0x50   : > { %1645 = vmatprep.subr.bf16.mxu1 %v2000_v19 }
  0x53   : > { %1646 = vmatpush3.bf16.msra.mxu1 %v2162_v45 }
  0x54   : > { %1647 = vmatprep.subr.bf16.mxu1 %v2000_v19 }
  0x57   : > { %1648 = vmatpush3.bf16.msra.mxu1 %v2174_v49 }
  0x58   : > { %1649 = vmatprep.subr.bf16.mxu1 %v2000_v19 }
  0x5b   : > { %1650 = vmatpush3.bf16.msra.mxu1 %v2187_v52 }
  0x5c   : > { %1651 = vmatprep.subr.bf16.mxu1 %v2000_v19 }
  0x5f   : > { %1652 = vmatpush3.bf16.msra.mxu1 %v2199_v55 }
  0x60   : > { %1677 = vmatprep.subr.bf16.mxu1 %v2000_v19 }
  0xfc   : > { %v2244_v5 = vpop.f32.mrb[0].mxu0 }
  0xfd   : > { %v380_v6 = vpop.f32.mrb[1].mxu0  ;;  %v389_v43 = vadd.f32 %v2244_v5, %v2259_v13 }
  0xfe   : > { %v2246_v7 = vpop.f32.mrb[2].mxu0  ;;  %v381_v14 = vadd.f32 %v2259_v13, %v380_v6 }
  0xff   : > { %v383_v8 = vpop.f32.mrb[3].mxu0  ;;  %v392_v54 = vadd.f32 %v2246_v7, %v2259_v13 }
 0x100   : > { %v384_v34 = vadd.f32 %v2259_v13, %v383_v8 }
 0x104   : > { %v2248_v9 = vpop.f32.mrb[4].mxu0 }
 0x105   : > { %v2250_v10 = vpop.f32.mrb[5].mxu0 }
 0x106   : > { %v2252_v11 = vpop.f32.mrb[6].mxu0  ;;  %v397_v63 = vadd.f32 %v2259_v13, %v2250_v10 }
 0x107   : > { %v2254_v12 = vpop.f32.mrb[7].mxu0 }
 0x108   : > { %v400_v7 = vadd.f32 %v2259_v13, %v2254_v12  ;;  %v405_v12 = vadd.f32 %v2248_v9, %v2259_v13  ;;  %v408_v9 = vadd.f32 %v2252_v11, %v2259_v13 }
 0x10c   : > { %v2284_v25 = vpop.f32.mrb[8].mxu0 }
 0x10d   : > { %v2286_v26 = vpop.f32.mrb[9].mxu0 }
 0x10e   : > { %v2288_v27 = vpop.f32.mrb[10].mxu0  ;;  %v413_v11 = vadd.f32 %v2259_v13, %v2286_v26 }
 0x10f   : > { %v2290_v28 = vpop.f32.mrb[11].mxu0 }
 0x110   : > { %v416_v26 = vadd.f32 %v2259_v13, %v2290_v28  ;;  %v421_v28 = vadd.f32 %v2284_v25, %v2259_v13  ;;  %v424_v25 = vadd.f32 %v2288_v27, %v2259_v13 }
 0x114   : > { %v2292_v29 = vpop.f32.mrb[12].mxu0 }
 0x115   : > { %v518_v15 = vpop.f32.mrb[0].mxu1  ;;  %v2294_v30 = vpop.f32.mrb[13].mxu0 }
 0x116   : > { %v524_v16 = vadd.f32 %v518_v15, %v381_v14  ;;  %v1615_v17 = vpop.f32.mrb[1].mxu1  ;;  %v2296_v31 = vpop.f32.mrb[14].mxu0  ;;  %v429_v27 = vadd.f32 %v2259_v13, %v2294_v30 }
 0x117   : > { %v521_v18 = vpop.f32.mrb[2].mxu1  ;;  %v2298_v32 = vpop.f32.mrb[15].mxu0 }
 0x118   : > { %1944 = vtanh.f32 %v524_v16  ;;  %v1616_v21 = vpop.f32.mrb[3].mxu1 }
 0x122   : > { %v1945_v23 = vpop.eup %1944 }
 0x123   : > { %526 = vst [vmem:[%s2263_s7] sm:$0xff] %v1945_v23  ;;  %v529_v24 = vpack.c.bf16 %v1945_v23, %v1945_v23 }
 0x125   : > { %1634 = vmatmul.mubr.bf16.vlgmr.msra.gmra.mrb[16].mxu0 %v529_v24 }
 0x126   : > { %1658 = vmatpush3.bf16.msra.mxu0 %v2099_v20  ;;  %1673 = vmatprep.mubr.msk.bf16.mxu0 %vm2001_vm0, %v2000_v19 }
 0x127   : > { %1659 = vmatprep.subr.bf16.mxu0 %v2000_v19 }
 0x12a   : > { %1660 = vmatpush3.bf16.msra.mxu0 %v2109_v22 }
 0x12b   : > { %1661 = vmatprep.subr.bf16.mxu0 %v2000_v19 }
 0x12e   : > { %1662 = vmatpush3.bf16.msra.mxu0 %v2132_v33 }
 0x12f   : > { %1663 = vmatprep.subr.bf16.mxu0 %v2000_v19 }
 0x132   : > { %1664 = vmatpush3.bf16.msra.mxu0 %v2146_v40 }
 0x133   : > { %1665 = vmatprep.subr.bf16.mxu0 %v2000_v19 }
 0x136   : > { %1666 = vmatpush3.bf16.msra.mxu0 %v2162_v45 }
 0x137   : > { %1667 = vmatprep.subr.bf16.mxu0 %v2000_v19 }
 0x13a   : > { %1668 = vmatpush3.bf16.msra.mxu0 %v2174_v49 }
 0x13b   : > { %1669 = vmatprep.subr.bf16.mxu0 %v2000_v19 }
 0x13e   : > { %1670 = vmatpush3.bf16.msra.mxu0 %v2187_v52 }
 0x13f   : > { %1671 = vmatprep.subr.bf16.mxu0 %v2000_v19 }
 0x142   : > { %1672 = vmatpush3.bf16.msra.mxu0 %v2199_v55 }
 0x143   : > { %1697 = vmatprep.subr.bf16.mxu0 %v2000_v19 }
 0x1f8   : > { %v564_v35 = vpop.f32.mrb[16].mxu0 }
 0x1f9   : > { %v570_v36 = vadd.f32 %v564_v35, %v384_v34  ;;  %v1635_v37 = vpop.f32.mrb[17].mxu0 }
 0x1fa   : > { %v567_v38 = vpop.f32.mrb[18].mxu0 }
 0x1fb   : > { %1946 = vtanh.f32 %v570_v36  ;;  %v1636_v39 = vpop.f32.mrb[19].mxu0 }
 0x205   : > { %v1947_v41 = vpop.eup %1946 }
 0x206   : > { %1407 = vst [vmem:[%s2263_s7 + $0x8] sm:$0xff] %v1947_v41  ;;  %v576_v42 = vpack.c.bf16 %v1947_v41, %v1947_v41 }
 0x208   : > { %1654 = vmatmul.mubr.bf16.vlgmr.msra.gmra.mrb[4].mxu1 %v576_v42 }
 0x209   : > { %1678 = vmatpush3.bf16.msra.mxu1 %v2099_v20  ;;  %1693 = vmatprep.mubr.msk.bf16.mxu1 %vm2001_vm0, %v2000_v19 }
 0x20a   : > { %1679 = vmatprep.subr.bf16.mxu1 %v2000_v19 }
 0x20d   : > { %1680 = vmatpush3.bf16.msra.mxu1 %v2109_v22 }
 0x20e   : > { %1681 = vmatprep.subr.bf16.mxu1 %v2000_v19 }
 0x211   : > { %1682 = vmatpush3.bf16.msra.mxu1 %v2132_v33 }
 0x212   : > { %1683 = vmatprep.subr.bf16.mxu1 %v2000_v19 }
 0x215   : > { %1684 = vmatpush3.bf16.msra.mxu1 %v2146_v40 }
 0x216   : > { %1685 = vmatprep.subr.bf16.mxu1 %v2000_v19 }
 0x219   : > { %1686 = vmatpush3.bf16.msra.mxu1 %v2162_v45 }
 0x21a   : > { %1687 = vmatprep.subr.bf16.mxu1 %v2000_v19 }
 0x21d   : > { %1688 = vmatpush3.bf16.msra.mxu1 %v2174_v49 }
 0x21e   : > { %1689 = vmatprep.subr.bf16.mxu1 %v2000_v19 }
 0x221   : > { %1690 = vmatpush3.bf16.msra.mxu1 %v2187_v52 }
 0x222   : > { %1691 = vmatprep.subr.bf16.mxu1 %v2000_v19 }
 0x225   : > { %1692 = vmatpush3.bf16.msra.mxu1 %v2199_v55 }
 0x226   : > { %1717 = vmatprep.subr.bf16.mxu1 %v2000_v19 }
 0x2db   : > { %v611_v44 = vpop.f32.mrb[4].mxu1 }
 0x2dc   : > { %v617_v46 = vadd.f32 %v611_v44, %v389_v43  ;;  %v1655_v47 = vpop.f32.mrb[5].mxu1 }
 0x2dd   : > { %v614_v48 = vpop.f32.mrb[6].mxu1 }
 0x2de   : > { %1948 = vtanh.f32 %v617_v46  ;;  %v1656_v50 = vpop.f32.mrb[7].mxu1 }
 0x2e8   : > { %v1949_v51 = vpop.eup %1948 }
 0x2e9   : > { %1408 = vst [vmem:[%s2263_s7 + $0x10] sm:$0xff] %v1949_v51  ;;  %v623_v53 = vpack.c.bf16 %v1949_v51, %v1949_v51 }
 0x2eb   : > { %1674 = vmatmul.mubr.bf16.vlgmr.msra.gmra.mrb[20].mxu0 %v623_v53 }
 0x2ec   : > { %1698 = vmatpush3.bf16.msra.mxu0 %v2099_v20  ;;  %1713 = vmatprep.mubr.msk.bf16.mxu0 %vm2001_vm0, %v2000_v19 }
 0x2ed   : > { %1699 = vmatprep.subr.bf16.mxu0 %v2000_v19 }
 0x2f0   : > { %1700 = vmatpush3.bf16.msra.mxu0 %v2109_v22 }
 0x2f1   : > { %1701 = vmatprep.subr.bf16.mxu0 %v2000_v19 }
 0x2f4   : > { %1702 = vmatpush3.bf16.msra.mxu0 %v2132_v33 }
 0x2f5   : > { %1703 = vmatprep.subr.bf16.mxu0 %v2000_v19 }
 0x2f8   : > { %1704 = vmatpush3.bf16.msra.mxu0 %v2146_v40 }
 0x2f9   : > { %1705 = vmatprep.subr.bf16.mxu0 %v2000_v19 }
 0x2fc   : > { %1706 = vmatpush3.bf16.msra.mxu0 %v2162_v45 }
 0x2fd   : > { %1707 = vmatprep.subr.bf16.mxu0 %v2000_v19 }
 0x300   : > { %1708 = vmatpush3.bf16.msra.mxu0 %v2174_v49 }
 0x301   : > { %1709 = vmatprep.subr.bf16.mxu0 %v2000_v19 }
 0x304   : > { %1710 = vmatpush3.bf16.msra.mxu0 %v2187_v52 }
 0x305   : > { %1711 = vmatprep.subr.bf16.mxu0 %v2000_v19 }
 0x308   : > { %1712 = vmatpush3.bf16.msra.mxu0 %v2199_v55 }
 0x309   : > { %1737 = vmatprep.subr.bf16.mxu0 %v2000_v19 }
 0x3be   : > { %v658_v56 = vpop.f32.mrb[20].mxu0 }
 0x3bf   : > { %v664_v57 = vadd.f32 %v658_v56, %v392_v54  ;;  %v1675_v58 = vpop.f32.mrb[21].mxu0 }
 0x3c0   : > { %v661_v59 = vpop.f32.mrb[22].mxu0 }
 0x3c1   : > { %1950 = vtanh.f32 %v664_v57  ;;  %v1676_v60 = vpop.f32.mrb[23].mxu0 }
 0x3cb   : > { %v1951_v61 = vpop.eup %1950 }
 0x3cc   : > { %1409 = vst [vmem:[%s2263_s7 + $0x18] sm:$0xff] %v1951_v61  ;;  %v670_v62 = vpack.c.bf16 %v1951_v61, %v1951_v61 }
 0x3ce   : > { %1694 = vmatmul.mubr.bf16.vlgmr.msra.gmra.mrb[8].mxu1 %v670_v62 }
 0x3cf   : > { %1718 = vmatpush3.bf16.msra.mxu1 %v2099_v20  ;;  %1733 = vmatprep.mubr.msk.bf16.mxu1 %vm2001_vm0, %v2000_v19 }
 0x3d0   : > { %1719 = vmatprep.subr.bf16.mxu1 %v2000_v19 }
 0x3d3   : > { %1720 = vmatpush3.bf16.msra.mxu1 %v2109_v22 }
 0x3d4   : > { %1721 = vmatprep.subr.bf16.mxu1 %v2000_v19 }
 0x3d7   : > { %1722 = vmatpush3.bf16.msra.mxu1 %v2132_v33 }
 0x3d8   : > { %1723 = vmatprep.subr.bf16.mxu1 %v2000_v19 }
 0x3db   : > { %1724 = vmatpush3.bf16.msra.mxu1 %v2146_v40 }
 0x3dc   : > { %1725 = vmatprep.subr.bf16.mxu1 %v2000_v19 }
 0x3df   : > { %1726 = vmatpush3.bf16.msra.mxu1 %v2162_v45 }
 0x3e0   : > { %1727 = vmatprep.subr.bf16.mxu1 %v2000_v19 }
 0x3e3   : > { %1728 = vmatpush3.bf16.msra.mxu1 %v2174_v49 }
 0x3e4   : > { %1729 = vmatprep.subr.bf16.mxu1 %v2000_v19 }
 0x3e7   : > { %1730 = vmatpush3.bf16.msra.mxu1 %v2187_v52 }
 0x3e8   : > { %1731 = vmatprep.subr.bf16.mxu1 %v2000_v19 }
 0x3eb   : > { %1732 = vmatpush3.bf16.msra.mxu1 %v2199_v55 }
 0x3ec   : > { %1757 = vmatprep.subr.bf16.mxu1 %v2000_v19 }
 0x4a1   : > { %v705_v0 = vpop.f32.mrb[8].mxu1 }
 0x4a2   : > { %v711_v1 = vadd.f32 %v705_v0, %v397_v63  ;;  %v1695_v2 = vpop.f32.mrb[9].mxu1 }
 0x4a3   : > { %v708_v3 = vpop.f32.mrb[10].mxu1 }
 0x4a4   : > { %1952 = vtanh.f32 %v711_v1  ;;  %v1696_v4 = vpop.f32.mrb[11].mxu1 }
 0x4ae   : > { %v1953_v5 = vpop.eup %1952 }
 0x4af   : > { %1410 = vst [vmem:[%s2263_s7 + $0x20] sm:$0xff] %v1953_v5  ;;  %v717_v6 = vpack.c.bf16 %v1953_v5, %v1953_v5 }
 0x4b1   : > { %1714 = vmatmul.mubr.bf16.vlgmr.msra.gmra.mrb[24].mxu0 %v717_v6 }
 0x4b2   : > { %1738 = vmatpush3.bf16.msra.mxu0 %v2099_v20  ;;  %1753 = vmatprep.mubr.msk.bf16.mxu0 %vm2001_vm0, %v2000_v19 }
 0x4b3   : > { %1739 = vmatprep.subr.bf16.mxu0 %v2000_v19 }
 0x4b6   : > { %1740 = vmatpush3.bf16.msra.mxu0 %v2109_v22 }
 0x4b7   : > { %1741 = vmatprep.subr.bf16.mxu0 %v2000_v19 }
 0x4ba   : > { %1742 = vmatpush3.bf16.msra.mxu0 %v2132_v33 }
 0x4bb   : > { %1743 = vmatprep.subr.bf16.mxu0 %v2000_v19 }
 0x4be   : > { %1744 = vmatpush3.bf16.msra.mxu0 %v2146_v40 }
 0x4bf   : > { %1745 = vmatprep.subr.bf16.mxu0 %v2000_v19 }
 0x4c2   : > { %1746 = vmatpush3.bf16.msra.mxu0 %v2162_v45 }
 0x4c3   : > { %1747 = vmatprep.subr.bf16.mxu0 %v2000_v19 }
 0x4c6   : > { %1748 = vmatpush3.bf16.msra.mxu0 %v2174_v49 }
 0x4c7   : > { %1749 = vmatprep.subr.bf16.mxu0 %v2000_v19 }
 0x4ca   : > { %1750 = vmatpush3.bf16.msra.mxu0 %v2187_v52 }
 0x4cb   : > { %1751 = vmatprep.subr.bf16.mxu0 %v2000_v19 }
 0x4ce   : > { %1752 = vmatpush3.bf16.msra.mxu0 %v2199_v55 }
 0x4cf   : > { %1777 = vmatprep.subr.bf16.mxu0 %v2000_v19 }
 0x584   : > { %v752_v8 = vpop.f32.mrb[24].mxu0 }
 0x585   : > { %v758_v10 = vadd.f32 %v752_v8, %v400_v7  ;;  %v1715_v14 = vpop.f32.mrb[25].mxu0 }
 0x586   : > { %v755_v15 = vpop.f32.mrb[26].mxu0 }
 0x587   : > { %1954 = vtanh.f32 %v758_v10  ;;  %v1716_v16 = vpop.f32.mrb[27].mxu0 }
 0x591   : > { %v1955_v17 = vpop.eup %1954 }
 0x592   : > { %1411 = vst [vmem:[%s2263_s7 + $0x28] sm:$0xff] %v1955_v17  ;;  %v764_v18 = vpack.c.bf16 %v1955_v17, %v1955_v17 }
 0x594   : > { %1734 = vmatmul.mubr.bf16.vlgmr.msra.gmra.mrb[12].mxu1 %v764_v18 }
 0x595   : > { %1758 = vmatpush3.bf16.msra.mxu1 %v2099_v20  ;;  %1773 = vmatprep.mubr.msk.bf16.mxu1 %vm2001_vm0, %v2000_v19 }
 0x596   : > { %1759 = vmatprep.subr.bf16.mxu1 %v2000_v19 }
 0x599   : > { %1760 = vmatpush3.bf16.msra.mxu1 %v2109_v22 }
 0x59a   : > { %1761 = vmatprep.subr.bf16.mxu1 %v2000_v19 }
 0x59d   : > { %1762 = vmatpush3.bf16.msra.mxu1 %v2132_v33 }
 0x59e   : > { %1763 = vmatprep.subr.bf16.mxu1 %v2000_v19 }
 0x5a1   : > { %1764 = vmatpush3.bf16.msra.mxu1 %v2146_v40 }
 0x5a2   : > { %1765 = vmatprep.subr.bf16.mxu1 %v2000_v19 }
 0x5a5   : > { %1766 = vmatpush3.bf16.msra.mxu1 %v2162_v45 }
 0x5a6   : > { %1767 = vmatprep.subr.bf16.mxu1 %v2000_v19 }
 0x5a9   : > { %1768 = vmatpush3.bf16.msra.mxu1 %v2174_v49 }
 0x5aa   : > { %1769 = vmatprep.subr.bf16.mxu1 %v2000_v19 }
 0x5ad   : > { %1770 = vmatpush3.bf16.msra.mxu1 %v2187_v52 }
 0x5ae   : > { %1771 = vmatprep.subr.bf16.mxu1 %v2000_v19 }
 0x5b1   : > { %1772 = vmatpush3.bf16.msra.mxu1 %v2199_v55 }
 0x5b2   : > { %1797 = vmatprep.subr.bf16.mxu1 %v2000_v19 }
 0x667   : > { %v799_v21 = vpop.f32.mrb[12].mxu1 }
 0x668   : > { %v805_v23 = vadd.f32 %v799_v21, %v405_v12  ;;  %v1735_v24 = vpop.f32.mrb[13].mxu1 }
 0x669   : > { %v802_v34 = vpop.f32.mrb[14].mxu1 }
 0x66a   : > { %1956 = vtanh.f32 %v805_v23  ;;  %v1736_v35 = vpop.f32.mrb[15].mxu1 }
 0x674   : > { %v1957_v36 = vpop.eup %1956 }
 0x675   : > { %1412 = vst [vmem:[%s2263_s7 + $0x30] sm:$0xff] %v1957_v36  ;;  %v811_v37 = vpack.c.bf16 %v1957_v36, %v1957_v36 }
 0x677   : > { %1754 = vmatmul.mubr.bf16.vlgmr.msra.gmra.mrb[28].mxu0 %v811_v37 }
 0x678   : > { %1778 = vmatpush3.bf16.msra.mxu0 %v2099_v20  ;;  %1793 = vmatprep.mubr.msk.bf16.mxu0 %vm2001_vm0, %v2000_v19 }
 0x679   : > { %1779 = vmatprep.subr.bf16.mxu0 %v2000_v19 }
 0x67c   : > { %1780 = vmatpush3.bf16.msra.mxu0 %v2109_v22 }
 0x67d   : > { %1781 = vmatprep.subr.bf16.mxu0 %v2000_v19 }
 0x680   : > { %1782 = vmatpush3.bf16.msra.mxu0 %v2132_v33 }
 0x681   : > { %1783 = vmatprep.subr.bf16.mxu0 %v2000_v19 }
 0x684   : > { %1784 = vmatpush3.bf16.msra.mxu0 %v2146_v40 }
 0x685   : > { %1785 = vmatprep.subr.bf16.mxu0 %v2000_v19 }
 0x688   : > { %1786 = vmatpush3.bf16.msra.mxu0 %v2162_v45 }
 0x689   : > { %1787 = vmatprep.subr.bf16.mxu0 %v2000_v19 }
 0x68c   : > { %1788 = vmatpush3.bf16.msra.mxu0 %v2174_v49 }
 0x68d   : > { %1789 = vmatprep.subr.bf16.mxu0 %v2000_v19 }
 0x690   : > { %1790 = vmatpush3.bf16.msra.mxu0 %v2187_v52 }
 0x691   : > { %1791 = vmatprep.subr.bf16.mxu0 %v2000_v19 }
 0x694   : > { %1792 = vmatpush3.bf16.msra.mxu0 %v2199_v55 }
 0x695   : > { %1817 = vmatprep.subr.bf16.mxu0 %v2000_v19 }
 0x74a   : > { %v846_v38 = vpop.f32.mrb[28].mxu0 }
 0x74b   : > { %v852_v39 = vadd.f32 %v846_v38, %v408_v9  ;;  %v1755_v41 = vpop.f32.mrb[29].mxu0 }
 0x74c   : > { %v849_v42 = vpop.f32.mrb[30].mxu0  ;;  %v440_v41 = vadd.f32 %v2296_v31, %v2259_v13  ;;  %v1300_v31 = vld [vmem:[%s2263_s7 + $0x8] sm:$0xff] (%p2058_p5) }
 0x74d   : > { %1958 = vtanh.f32 %v852_v39  ;;  %v1756_v43 = vpop.f32.mrb[31].mxu0  ;;  %1301 = vst [vmem:[%s1240_s23 + $0x10] sm:$0xff] (%p2058_p5), %v1300_v31 }
 0x757   : > { %v1959_v44 = vpop.eup %1958 }
 0x758   : > { %1413 = vst [vmem:[%s2263_s7 + $0x38] sm:$0xff] %v1959_v44  ;;  %v858_v46 = vpack.c.bf16 %v1959_v44, %v1959_v44 }
 0x75a   : > { %1774 = vmatmul.mubr.bf16.vlgmr.msra.gmra.mrb[16].mxu1 %v858_v46 }
 0x75b   : > { %1798 = vmatpush3.bf16.msra.mxu1 %v2099_v20  ;;  %1813 = vmatprep.mubr.msk.bf16.mxu1 %vm2001_vm0, %v2000_v19 }
 0x75c   : > { %1799 = vmatprep.subr.bf16.mxu1 %v2000_v19 }
 0x75f   : > { %1800 = vmatpush3.bf16.msra.mxu1 %v2109_v22 }
 0x760   : > { %1801 = vmatprep.subr.bf16.mxu1 %v2000_v19 }
 0x763   : > { %1802 = vmatpush3.bf16.msra.mxu1 %v2132_v33 }
 0x764   : > { %1803 = vmatprep.subr.bf16.mxu1 %v2000_v19 }
 0x767   : > { %1804 = vmatpush3.bf16.msra.mxu1 %v2146_v40 }
 0x768   : > { %1805 = vmatprep.subr.bf16.mxu1 %v2000_v19 }
 0x76b   : > { %1806 = vmatpush3.bf16.msra.mxu1 %v2162_v45 }
 0x76c   : > { %1807 = vmatprep.subr.bf16.mxu1 %v2000_v19 }
 0x76f   : > { %1808 = vmatpush3.bf16.msra.mxu1 %v2174_v49 }
 0x770   : > { %1809 = vmatprep.subr.bf16.mxu1 %v2000_v19 }
 0x773   : > { %1810 = vmatpush3.bf16.msra.mxu1 %v2187_v52 }
 0x774   : > { %1811 = vmatprep.subr.bf16.mxu1 %v2000_v19 }
 0x777   : > { %1812 = vmatpush3.bf16.msra.mxu1 %v2199_v55 }
 0x778   : > { %1837 = vmatprep.subr.bf16.mxu1 %v2000_v19 }
 0x82d   : > { %v893_v47 = vpop.f32.mrb[16].mxu1 }
 0x82e   : > { %v899_v48 = vadd.f32 %v893_v47, %v413_v11  ;;  %v1775_v50 = vpop.f32.mrb[17].mxu1  ;;  %v1302_v47 = vld [vmem:[%s2263_s7 + $0x10] sm:$0xff] (%p2058_p5) }
 0x82f   : > { %v896_v51 = vpop.f32.mrb[18].mxu1  ;;  %v1306_v50 = vld [vmem:[%s2263_s7 + $0x20] sm:$0xff] (%p2058_p5)  ;;  %1303 = vst [vmem:[%s1240_s23 + $0x20] sm:$0xff] (%p2058_p5), %v1302_v47 }
 0x830   : > { %1960 = vtanh.f32 %v899_v48  ;;  %v1776_v53 = vpop.f32.mrb[19].mxu1  ;;  %v1304_v48 = vld [vmem:[%s2263_s7 + $0x18] sm:$0xff] (%p2058_p5)  ;;  %v1308_v51 = vld [vmem:[%s2263_s7 + $0x28] sm:$0xff] (%p2058_p5)  ;;  %1307 = vst [vmem:[%s1240_s23 + $0x40] sm:$0xff] (%p2058_p5), %v1306_v50 }
 0x831   : > { %1305 = vst [vmem:[%s1240_s23 + $0x30] sm:$0xff] (%p2058_p5), %v1304_v48  ;;  %1309 = vst [vmem:[%s1240_s23 + $0x50] sm:$0xff] (%p2058_p5), %v1308_v51  ;;  %v1310_v53 = vld [vmem:[%s2263_s7 + $0x30] sm:$0xff] (%p2058_p5) }
 0x832   : > { %1311 = vst [vmem:[%s1240_s23 + $0x60] sm:$0xff] (%p2058_p5), %v1310_v53 }
 0x83a   : > { %v1961_v54 = vpop.eup %1960 }
 0x83b   : > { %1414 = vst [vmem:[%s2263_s7 + $0x40] sm:$0xff] %v1961_v54  ;;  %v905_v56 = vpack.c.bf16 %v1961_v54, %v1961_v54  ;;  %v1312_v54 = vld [vmem:[%s2263_s7 + $0x38] sm:$0xff] (%p2058_p5) }
 0x83c   : > { %1313 = vst [vmem:[%s1240_s23 + $0x70] sm:$0xff] (%p2058_p5), %v1312_v54 }
 0x83d   : > { %1794 = vmatmul.mubr.bf16.vlgmr.msra.gmra.mrb[32].mxu0 %v905_v56 }
 0x83e   : > { %1818 = vmatpush3.bf16.msra.mxu0 %v2099_v20  ;;  %1833 = vmatprep.mubr.msk.bf16.mxu0 %vm2001_vm0, %v2000_v19 }
 0x83f   : > { %1819 = vmatprep.subr.bf16.mxu0 %v2000_v19 }
 0x842   : > { %1820 = vmatpush3.bf16.msra.mxu0 %v2109_v22  ;;  %v1314_v56 = vld [vmem:[%s2263_s7 + $0x40] sm:$0xff] (%p2058_p5) }
 0x843   : > { %1821 = vmatprep.subr.bf16.mxu0 %v2000_v19  ;;  %1315 = vst [vmem:[%s1240_s23 + $0x80] sm:$0xff] (%p2058_p5), %v1314_v56 }
 0x846   : > { %1822 = vmatpush3.bf16.msra.mxu0 %v2132_v33 }
 0x847   : > { %1823 = vmatprep.subr.bf16.mxu0 %v2000_v19 }
 0x84a   : > { %1824 = vmatpush3.bf16.msra.mxu0 %v2146_v40 }
 0x84b   : > { %1825 = vmatprep.subr.bf16.mxu0 %v2000_v19 }
 0x84e   : > { %1826 = vmatpush3.bf16.msra.mxu0 %v2162_v45 }
 0x84f   : > { %1827 = vmatprep.subr.bf16.mxu0 %v2000_v19 }
 0x852   : > { %1828 = vmatpush3.bf16.msra.mxu0 %v2174_v49 }
 0x853   : > { %1829 = vmatprep.subr.bf16.mxu0 %v2000_v19 }
 0x856   : > { %1830 = vmatpush3.bf16.msra.mxu0 %v2187_v52 }
 0x857   : > { %1831 = vmatprep.subr.bf16.mxu0 %v2000_v19 }
 0x85a   : > { %1832 = vmatpush3.bf16.msra.mxu0 %v2199_v55 }
 0x85b   : > { %1857 = vmatprep.subr.bf16.mxu0 %v2000_v19 }
 0x910   : > { %v940_v57 = vpop.f32.mrb[32].mxu0 }
 0x911   : > { %v946_v58 = vadd.f32 %v940_v57, %v416_v26  ;;  %v1795_v59 = vpop.f32.mrb[33].mxu0 }
 0x912   : > { %v943_v60 = vpop.f32.mrb[34].mxu0 }
 0x913   : > { %1962 = vtanh.f32 %v946_v58  ;;  %v1796_v61 = vpop.f32.mrb[35].mxu0 }
 0x91d   : > { %v1963_v62 = vpop.eup %1962 }
 0x91e   : > { %1415 = vst [vmem:[%s2263_s7 + $0x48] sm:$0xff] %v1963_v62  ;;  %v952_v63 = vpack.c.bf16 %v1963_v62, %v1963_v62 }
 0x920   : > { %1814 = vmatmul.mubr.bf16.vlgmr.msra.gmra.mrb[20].mxu1 %v952_v63 }
 0x921   : > { %1838 = vmatpush3.bf16.msra.mxu1 %v2099_v20  ;;  %1853 = vmatprep.mubr.msk.bf16.mxu1 %vm2001_vm0, %v2000_v19 }
 0x922   : > { %1839 = vmatprep.subr.bf16.mxu1 %v2000_v19 }
 0x925   : > { %1840 = vmatpush3.bf16.msra.mxu1 %v2109_v22  ;;  %v1316_v26 = vld [vmem:[%s2263_s7 + $0x48] sm:$0xff] (%p2058_p5) }
 0x926   : > { %1841 = vmatprep.subr.bf16.mxu1 %v2000_v19  ;;  %1317 = vst [vmem:[%s1240_s23 + $0x90] sm:$0xff] (%p2058_p5), %v1316_v26 }
 0x929   : > { %1842 = vmatpush3.bf16.msra.mxu1 %v2132_v33 }
 0x92a   : > { %1843 = vmatprep.subr.bf16.mxu1 %v2000_v19 }
 0x92d   : > { %1844 = vmatpush3.bf16.msra.mxu1 %v2146_v40 }
 0x92e   : > { %1845 = vmatprep.subr.bf16.mxu1 %v2000_v19 }
 0x931   : > { %1846 = vmatpush3.bf16.msra.mxu1 %v2162_v45 }
 0x932   : > { %1847 = vmatprep.subr.bf16.mxu1 %v2000_v19 }
 0x935   : > { %1848 = vmatpush3.bf16.msra.mxu1 %v2174_v49 }
 0x936   : > { %1849 = vmatprep.subr.bf16.mxu1 %v2000_v19 }
 0x939   : > { %1850 = vmatpush3.bf16.msra.mxu1 %v2187_v52 }
 0x93a   : > { %1851 = vmatprep.subr.bf16.mxu1 %v2000_v19 }
 0x93d   : > { %1852 = vmatpush3.bf16.msra.mxu1 %v2199_v55 }
 0x93e   : > { %1877 = vmatprep.subr.bf16.mxu1 %v2000_v19 }
 0x9f3   : > { %v987_v0 = vpop.f32.mrb[20].mxu1 }
 0x9f4   : > { %v993_v1 = vadd.f32 %v987_v0, %v421_v28  ;;  %v1815_v2 = vpop.f32.mrb[21].mxu1 }
 0x9f5   : > { %v990_v3 = vpop.f32.mrb[22].mxu1 }
 0x9f6   : > { %1964 = vtanh.f32 %v993_v1  ;;  %v1816_v4 = vpop.f32.mrb[23].mxu1 }
 0xa00   : > { %v1965_v5 = vpop.eup %1964 }
 0xa01   : > { %1416 = vst [vmem:[%s2263_s7 + $0x50] sm:$0xff] %v1965_v5  ;;  %v999_v6 = vpack.c.bf16 %v1965_v5, %v1965_v5 }
 0xa03   : > { %1834 = vmatmul.mubr.bf16.vlgmr.msra.gmra.mrb[36].mxu0 %v999_v6 }
 0xa04   : > { %1858 = vmatpush3.bf16.msra.mxu0 %v2099_v20  ;;  %1873 = vmatprep.mubr.msk.bf16.mxu0 %vm2001_vm0, %v2000_v19 }
 0xa05   : > { %1859 = vmatprep.subr.bf16.mxu0 %v2000_v19 }
 0xa08   : > { %1860 = vmatpush3.bf16.msra.mxu0 %v2109_v22  ;;  %v1318_v57 = vld [vmem:[%s2263_s7 + $0x50] sm:$0xff] (%p2058_p5) }
 0xa09   : > { %1861 = vmatprep.subr.bf16.mxu0 %v2000_v19  ;;  %1319 = vst [vmem:[%s1240_s23 + $0xa0] sm:$0xff] (%p2058_p5), %v1318_v57 }
 0xa0c   : > { %1862 = vmatpush3.bf16.msra.mxu0 %v2132_v33 }
 0xa0d   : > { %1863 = vmatprep.subr.bf16.mxu0 %v2000_v19 }
 0xa10   : > { %1864 = vmatpush3.bf16.msra.mxu0 %v2146_v40 }
 0xa11   : > { %1865 = vmatprep.subr.bf16.mxu0 %v2000_v19 }
 0xa14   : > { %1866 = vmatpush3.bf16.msra.mxu0 %v2162_v45 }
 0xa15   : > { %1867 = vmatprep.subr.bf16.mxu0 %v2000_v19 }
 0xa18   : > { %1868 = vmatpush3.bf16.msra.mxu0 %v2174_v49 }
 0xa19   : > { %1869 = vmatprep.subr.bf16.mxu0 %v2000_v19 }
 0xa1c   : > { %1870 = vmatpush3.bf16.msra.mxu0 %v2187_v52 }
 0xa1d   : > { %1871 = vmatprep.subr.bf16.mxu0 %v2000_v19 }
 0xa20   : > { %1872 = vmatpush3.bf16.msra.mxu0 %v2199_v55 }
 0xa21   : > { %1897 = vmatprep.subr.bf16.mxu0 %v2000_v19 }
 0xad6   : > { %v1034_v7 = vpop.f32.mrb[36].mxu0 }
 0xad7   : > { %v1040_v8 = vadd.f32 %v1034_v7, %v424_v25  ;;  %v1835_v10 = vpop.f32.mrb[37].mxu0 }
 0xad8   : > { %v1037_v14 = vpop.f32.mrb[38].mxu0 }
 0xad9   : > { %1966 = vtanh.f32 %v1040_v8  ;;  %v1836_v15 = vpop.f32.mrb[39].mxu0 }
 0xae3   : > { %v1967_v16 = vpop.eup %1966 }
 0xae4   : > { %1417 = vst [vmem:[%s2263_s7 + $0x58] sm:$0xff] %v1967_v16  ;;  %v1046_v17 = vpack.c.bf16 %v1967_v16, %v1967_v16 }
 0xae6   : > { %1854 = vmatmul.mubr.bf16.vlgmr.msra.gmra.mrb[24].mxu1 %v1046_v17 }
 0xae7   : > { %1878 = vmatpush3.bf16.msra.mxu1 %v2099_v20  ;;  %1893 = vmatprep.mubr.msk.bf16.mxu1 %vm2001_vm0, %v2000_v19 }
 0xae8   : > { %1879 = vmatprep.subr.bf16.mxu1 %v2000_v19 }
 0xaeb   : > { %1880 = vmatpush3.bf16.msra.mxu1 %v2109_v22  ;;  %v1320_v58 = vld [vmem:[%s2263_s7 + $0x58] sm:$0xff] (%p2058_p5) }
 0xaec   : > { %1881 = vmatprep.subr.bf16.mxu1 %v2000_v19  ;;  %1321 = vst [vmem:[%s1240_s23 + $0xb0] sm:$0xff] (%p2058_p5), %v1320_v58 }
 0xaef   : > { %1882 = vmatpush3.bf16.msra.mxu1 %v2132_v33 }
 0xaf0   : > { %1883 = vmatprep.subr.bf16.mxu1 %v2000_v19 }
 0xaf3   : > { %1884 = vmatpush3.bf16.msra.mxu1 %v2146_v40 }
 0xaf4   : > { %1885 = vmatprep.subr.bf16.mxu1 %v2000_v19 }
 0xaf7   : > { %1886 = vmatpush3.bf16.msra.mxu1 %v2162_v45 }
 0xaf8   : > { %1887 = vmatprep.subr.bf16.mxu1 %v2000_v19 }
 0xafb   : > { %1888 = vmatpush3.bf16.msra.mxu1 %v2174_v49 }
 0xafc   : > { %1889 = vmatprep.subr.bf16.mxu1 %v2000_v19 }
 0xaff   : > { %1890 = vmatpush3.bf16.msra.mxu1 %v2187_v52 }
 0xb00   : > { %1891 = vmatprep.subr.bf16.mxu1 %v2000_v19 }
 0xb03   : > { %1892 = vmatpush3.bf16.msra.mxu1 %v2199_v55 }
 0xbb9   : > { %v1081_v18 = vpop.f32.mrb[24].mxu1 }
 0xbba   : > { %v1087_v12 = vadd.f32 %v1081_v18, %v429_v27  ;;  %v1855_v21 = vpop.f32.mrb[25].mxu1 }
 0xbbb   : > { %v1084_v23 = vpop.f32.mrb[26].mxu1 }
 0xbbc   : > { %1968 = vtanh.f32 %v1087_v12  ;;  %v1856_v24 = vpop.f32.mrb[27].mxu1 }
 0xbc6   : > { %v1969_v34 = vpop.eup %1968 }
 0xbc7   : > { %1418 = vst [vmem:[%s2263_s7 + $0x60] sm:$0xff] %v1969_v34  ;;  %v1093_v35 = vpack.c.bf16 %v1969_v34, %v1969_v34 }
 0xbc9   : > { %1874 = vmatmul.mubr.bf16.vlgmr.msra.gmra.mrb[40].mxu0 %v1093_v35 }
 0xbca   : > { %1898 = vmatpush3.bf16.msra.mxu0 %v2099_v20  ;;  %1913 = vmatprep.mubr.msk.bf16.mxu0 %vm2001_vm0, %v2000_v19  ;;  %v432_v20 = vadd.f32 %v2259_v13, %v2298_v32 }
 0xbcb   : > { %1899 = vmatprep.subr.bf16.mxu0 %v2000_v19 }
 0xbce   : > { %1900 = vmatpush3.bf16.msra.mxu0 %v2109_v22  ;;  %v1322_v59 = vld [vmem:[%s2263_s7 + $0x60] sm:$0xff] (%p2058_p5) }
 0xbcf   : > { %1901 = vmatprep.subr.bf16.mxu0 %v2000_v19  ;;  %1323 = vst [vmem:[%s1240_s23 + $0xc0] sm:$0xff] (%p2058_p5), %v1322_v59 }
 0xbd2   : > { %1902 = vmatpush3.bf16.msra.mxu0 %v2132_v33 }
 0xbd3   : > { %1903 = vmatprep.subr.bf16.mxu0 %v2000_v19 }
 0xbd6   : > { %1904 = vmatpush3.bf16.msra.mxu0 %v2146_v40 }
 0xbd7   : > { %1905 = vmatprep.subr.bf16.mxu0 %v2000_v19 }
 0xbda   : > { %1906 = vmatpush3.bf16.msra.mxu0 %v2162_v45 }
 0xbdb   : > { %1907 = vmatprep.subr.bf16.mxu0 %v2000_v19 }
 0xbde   : > { %1908 = vmatpush3.bf16.msra.mxu0 %v2174_v49 }
 0xbdf   : > { %1909 = vmatprep.subr.bf16.mxu0 %v2000_v19 }
 0xbe2   : > { %1910 = vmatpush3.bf16.msra.mxu0 %v2187_v52  ;;  %v437_v52 = vadd.f32 %v2292_v29, %v2259_v13  ;;  %v1298_v13 = vld [vmem:[%s2263_s7] sm:$0xff] (%p2058_p5) }
 0xbe3   : > { %1911 = vmatprep.subr.bf16.mxu0 %v2000_v19  ;;  %1299 = vst [vmem:[%s1240_s23] sm:$0xff] (%p2058_p5), %v1298_v13 }
 0xbe6   : > { %1912 = vmatpush3.bf16.msra.mxu0 %v2199_v55 }
 0xc9c   : > { %v1128_v22 = vpop.f32.mrb[40].mxu0 }
 0xc9d   : > { %v1134_v33 = vadd.f32 %v1128_v22, %v432_v20  ;;  %v1875_v40 = vpop.f32.mrb[41].mxu0 }
 0xc9e   : > { %v1131_v45 = vpop.f32.mrb[42].mxu0 }
 0xc9f   : > { %1970 = vtanh.f32 %v1134_v33  ;;  %v1876_v30 = vpop.f32.mrb[43].mxu0 }
 0xca9   : > { %v1971_v36 = vpop.eup %1970 }
 0xcaa   : > { %1419 = vst [vmem:[%s2263_s7 + $0x68] sm:$0xff] %v1971_v36  ;;  %v1140_v49 = vpack.c.bf16 %v1971_v36, %v1971_v36 }
 0xcac   : > { %1894 = vmatmul.mubr.bf16.vlgmr.msra.gmra.mrb[28].mxu1 %v1140_v49 }
 0xcb1   : > { %v1324_v60 = vld [vmem:[%s2263_s7 + $0x68] sm:$0xff] (%p2058_p5) }
 0xcb2   : > { %1325 = vst [vmem:[%s1240_s23 + $0xd0] sm:$0xff] (%p2058_p5), %v1324_v60 }
 0xd7f   : > { %v1175_v19 = vpop.f32.mrb[28].mxu1 }
 0xd80   : > { %v1181_v37 = vadd.f32 %v1175_v19, %v437_v52  ;;  %v1895_v55 = vpop.f32.mrb[29].mxu1 }
 0xd81   : > { %v1178_v9 = vpop.f32.mrb[30].mxu1 }
 0xd82   : > { %1972 = vtanh.f32 %v1181_v37  ;;  %v1896_v32 = vpop.f32.mrb[31].mxu1 }
 0xd8c   : > { %v1973_v38 = vpop.eup %1972 }
 0xd8d   : > { %1420 = vst [vmem:[%s2263_s7 + $0x70] sm:$0xff] %v1973_v38  ;;  %v1187_v39 = vpack.c.bf16 %v1973_v38, %v1973_v38 }
 0xd8f   : > { %1914 = vmatmul.mubr.bf16.vlgmr.msra.gmra.mrb[44].mxu0 %v1187_v39 }
 0xd94   : > { %v1326_v61 = vld [vmem:[%s2263_s7 + $0x70] sm:$0xff] (%p2058_p5) }
 0xd95   : > { %1327 = vst [vmem:[%s1240_s23 + $0xe0] sm:$0xff] (%p2058_p5), %v1326_v61 }
 0xe62   : > { %v1222_v42 = vpop.f32.mrb[44].mxu0 }
 0xe63   : > { %v1228_v43 = vadd.f32 %v1222_v42, %v440_v41  ;;  %v1915_v44 = vpop.f32.mrb[45].mxu0 }
 0xe64   : > { %v1225_v46 = vpop.f32.mrb[46].mxu0 }
 0xe65   : > { %1974 = vtanh.f32 %v1228_v43  ;;  %v1916_v29 = vpop.f32.mrb[47].mxu0 }
 0xe6a   : > { %1238 = sbr.rel (!%p2058_p5) target bundleno = 3705 (0xe79), region = 78 }
 0xe6f   : > { %v1975_v11 = vpop.eup %1974 }
 0xe70   : > { %1421 = vst [vmem:[%s2263_s7 + $0x78] sm:$0xff] %v1975_v11 }
 0xe77   : > { %v1328_v62 = vld [vmem:[%s2263_s7 + $0x78] sm:$0xff] }
 0xe78   : > { %1329 = vst [vmem:[%s1240_s23 + $0xf0] sm:$0xff] %v1328_v62 }
 0xe79 PF: > { %p11_p10 = scmp.ge.s32.totalorder %s2045_s19, 4   ;;  %s2597_s15 = smov %s1994_s16 }
 0xe7a   : > { %s2598_s16 = smov %s2056_s22  ;;  %s2599_s17 = smov %s2045_s19 }
 0xe7b   :  { %13 = sbr.rel (!%p11_p10) target bundleno = 2 (0x2), region = 177 }

</bundles_post_ra>
